<compile_context>
chip_gen: v7x
topology: tpu7x:2x2x1
jax: 0.10.0
libtpu: 0.0.40
codegen_flags: <defaults>
</compile_context>

<pallas_src>
import functools

import jax
import jax.numpy as jnp
import numpy as np
from jax import lax
from jax.experimental import pallas as pl
from jax.experimental.pallas import tpu as pltpu

# ----------------------------- configuration ---------------------------------
QLEN = 8           # query length
BSZ = 2            # batch size
D_MODEL = 128      # model width (128 -> lane-dense activations / output stores)
N_HEAD = 4         # heads
D_HEAD = 32        # per-head width
RLEN = QLEN        # relative-position length (== klen when mems is None)
KLEN = QLEN
RPAD = 128         # relative embeddings zero-padded to a 128-lane multiple for the rotate
SCALE = 1.0 / (D_HEAD ** 0.5)
LN_EPS = 1e-5
NEG_INF = -1e30    # large finite negative (robust vs. fully-masked rows)


# ----------------------------- fused Pallas kernel ----------------------------
def _fused_attn_kernel(w_ref, r_ref, wqkv_ref, wr_ref, wo_ref,
                       rwb_ref, rrb_ref, g_ref, b_ref, o_ref,
                       *, scale, eps, n_head, d_head, klen, rpad):
    # Shapes (per grid step = one batch element):
    #   w_ref    : (1, Q, DM)      f32 token slab (projection source AND residual)
    #   r_ref    : (RPAD, DM)      bf16 relative embeddings, rows >= rlen are zero
    #   wqkv_ref : (DM, 3*H*D)     bf16 fused QKV weights (q | k | v, each H*D lanes)
    #   wr_ref   : (DM, H*D)       bf16 relative-key weights
    #   wo_ref   : (H*D, DM)       bf16 output projection
    #   rwb/rrb  : (H, 1, D)       f32 relative biases
    #   g/b_ref  : (1, DM)         f32 LayerNorm gamma / beta
    #   o_ref    : (1, Q, DM)      f32
    f32 = jnp.float32
    bf16 = jnp.bfloat16
    Q = w_ref.shape[1]
    H, D = n_head, d_head
    HD = H * D
    K = klen

    w_f32 = w_ref[0]                       # (Q, DM) -- read once; reused for residual
    w_bf = w_f32.astype(bf16)

    # One lane-dense MXU call for the whole QKV projection (Q, 3*H*D).
    qkv = jnp.dot(w_bf, wqkv_ref[...], preferred_element_type=f32)
    # Relative-key projection over the zero-padded embeddings (RPAD, H*D).
    # (batch-invariant; recomputed per batch block -- negligible at this size)
    rk_all = jnp.dot(r_ref[...], wr_ref[...], preferred_element_type=f32)

    # Causal mask (mem_len == 0), generated in-kernel.
    row = lax.broadcasted_iota(jnp.int32, (Q, K), 0)
    col = lax.broadcasted_iota(jnp.int32, (Q, K), 1)
    causal = col > row
    neg = f32(NEG_INF)

    cdims = (((1,), (1,)), ((), ()))       # contract last dims: A @ B.T
    # Strided rotate: row i of bd_raw must be read at column j + (K-1) - i, i.e. every row
    # is rolled by -(K-1-i). pltpu.roll applies an effective shift of (shift + i*stride)
    # per row, so shift = RPAD - (K-1), stride = 1 gives source (j + K-1 - i) mod RPAD.
    roll_shift = (rpad - (K - 1)) % rpad

    head_out = []
    for h in range(H):                     # static unroll (H is small at toy size)
        q_h = qkv[:, h * D:(h + 1) * D]                              # (Q, D) f32
        k_h = qkv[:, HD + h * D: HD + (h + 1) * D].astype(bf16)      # (K, D)
        v_h = qkv[:, 2 * HD + h * D: 2 * HD + (h + 1) * D].astype(bf16)
        rk_h = rk_all[:, h * D:(h + 1) * D].astype(bf16)             # (RPAD, D)

        q_rw = (q_h + rwb_ref[h]).astype(bf16)                       # (Q, D)
        q_rr = (q_h + rrb_ref[h]).astype(bf16)

        # AC[i, j] = (q + r_w_bias)[i] . k[j]
        ac = lax.dot_general(q_rw, k_h, cdims, preferred_element_type=f32)       # (Q, K)
        # BD_raw[i, m] = (q + r_r_bias)[i] . rk[m]  (m over the padded RPAD lanes),
        # then the relative shift happens entirely on the VMEM tile via one XLU rotate.
        bd_raw = lax.dot_general(q_rr, rk_h, cdims, preferred_element_type=f32)  # (Q, RPAD)
        bd = pltpu.roll(bd_raw, roll_shift, 1, stride=1, stride_axis=0)[:, :K]   # (Q, K)
        # (out-of-range / wrapped entries read zero-padded rows and are causally masked)

        score = (ac + bd) * scale
        score = jnp.where(causal, neg, score)

        # softmax over keys (f32 VPU/EUP math)
        mx = jnp.max(score, axis=1, keepdims=True)
        e = jnp.exp(score - mx)
        denom = jnp.sum(e, axis=1, keepdims=True)
        prob = e * pl.reciprocal(denom, approx=True)

        head_out.append(jnp.dot(prob.astype(bf16), v_h, preferred_element_type=f32))

    # Single lane-dense output projection: (Q, H*D) @ (H*D, DM).
    av = jnp.concatenate(head_out, axis=1).astype(bf16)              # (Q, H*D)
    attn_out = jnp.dot(av, wo_ref[...], preferred_element_type=f32)  # (Q, DM)

    # residual + post-LayerNorm (pre_lnorm = False path), all f32
    x = w_f32 + attn_out
    mean = jnp.mean(x, axis=1, keepdims=True)
    xc = x - mean
    var = jnp.mean(xc * xc, axis=1, keepdims=True)
    xn = xc * lax.rsqrt(var + eps)
    o_ref[0] = xn * g_ref[...] + b_ref[...]


# ----------------------------- wrapper ----------------------------------------
@jax.jit
def rel_partial_attn_forward(w, r, params):
    """w: (qlen, bsz, d_model), r: (rlen, d_model). Returns (qlen, bsz, d_model)."""
    qlen, bsz, d_model = w.shape
    rlen = r.shape[0]
    H, D = N_HEAD, D_HEAD
    HD = H * D
    klen = qlen                                   # mems / incremental_state not implemented
    if rlen != qlen:
        raise NotImplementedError("rlen must equal qlen (mems=None path)")
    rpad = max(128, ((rlen + 127) // 128) * 128)  # lane-dense rotate + zero rows for OOR BD

    bf16 = jnp.bfloat16
    # Weights pre-cast to bf16 (MXU-native); biases / LN params stay f32.
    wqkv_bf = params["wqkv_t"].astype(bf16)                    # (DM, 3*H*D)
    wr_bf = params["wr_t"].astype(bf16)                        # (DM, H*D)
    wo_bf = params["wo_t"].astype(bf16)                        # (H*D, DM)
    rwb = params["r_w_bias"].reshape(H, 1, D).astype(jnp.float32)
    rrb = params["r_r_bias"].reshape(H, 1, D).astype(jnp.float32)
    g = params["ln_g"].reshape(1, d_model).astype(jnp.float32)
    b = params["ln_b"].reshape(1, d_model).astype(jnp.float32)

    # Batch-major activation slab (one lane-dense (Q, DM) block per grid step).
    # (negligible here; at real sizes keep activations batch-major end-to-end instead)
    w_bqd = jnp.transpose(w, (1, 0, 2))                        # (B, Q, DM)
    r_pad = jnp.zeros((rpad, d_model), bf16).at[:rlen].set(r.astype(bf16))

    kernel = functools.partial(_fused_attn_kernel, scale=SCALE, eps=LN_EPS,
                               n_head=H, d_head=D, klen=klen, rpad=rpad)
    out_bqd = pl.pallas_call(
        kernel,
        grid=(bsz,),
        in_specs=[
            pl.BlockSpec((1, qlen, d_model), lambda i: (i, 0, 0)),   # w (this batch)
            # Everything below uses a constant index_map -> DMA'd once, kept resident.
            pl.BlockSpec((rpad, d_model), lambda i: (0, 0)),         # r (zero-padded, bf16)
            pl.BlockSpec((d_model, 3 * HD), lambda i: (0, 0)),       # fused qkv weights
            pl.BlockSpec((d_model, HD), lambda i: (0, 0)),           # r_net weights
            pl.BlockSpec((HD, d_model), lambda i: (0, 0)),           # o_net weights
            pl.BlockSpec((H, 1, D), lambda i: (0, 0, 0)),            # r_w_bias
            pl.BlockSpec((H, 1, D), lambda i: (0, 0, 0)),            # r_r_bias
            pl.BlockSpec((1, d_model), lambda i: (0, 0)),            # ln gamma
            pl.BlockSpec((1, d_model), lambda i: (0, 0)),            # ln beta
        ],
        out_specs=pl.BlockSpec((1, qlen, d_model), lambda i: (i, 0, 0)),
        out_shape=jax.ShapeDtypeStruct((bsz, qlen, d_model), jnp.float32),
        compiler_params=pltpu.CompilerParams(dimension_semantics=("parallel",)),
    )(w_bqd, r_pad, wqkv_bf, wr_bf, wo_bf, rwb, rrb, g, b)

    return jnp.transpose(out_bqd, (1, 0, 2))                        # (Q, B, DM)


# ----------------------------- pure-JAX reference -----------------------------
def _rel_shift_ref(x):
    Q, R, B, N = x.shape
    pad = jnp.ones((Q, 1, B, N), x.dtype)
    xp = jnp.concatenate([pad, x], axis=1).reshape(Q * (R + 1), B, N)
    return xp[Q:].reshape(Q, R, B, N)


def reference_forward(w, r, params, mask2d):
    H, D = N_HEAD, D_HEAD
    qlen, bsz, _ = w.shape
    rlen = r.shape[0]
    with jax.default_matmul_precision("highest"):
        w_heads = jnp.einsum("qbm,mo->qbo", w, params["wqkv_t"])
        r_head_k = r @ params["wr_t"]
        q, k, v = jnp.split(w_heads, 3, axis=-1)
        q = q.reshape(qlen, bsz, H, D)
        k = k.reshape(qlen, bsz, H, D)
        v = v.reshape(qlen, bsz, H, D)
        rk = r_head_k.reshape(rlen, H, D)
        AC = jnp.einsum("ibnd,jbnd->ijbn", q + params["r_w_bias"], k)
        BD = jnp.einsum("ibnd,jnd->ijbn", q + params["r_r_bias"], rk)
        BD = _rel_shift_ref(BD)
        score = (AC + BD) * SCALE
        score = jnp.where(mask2d[:, :, None, None] > 0.5, -jnp.inf, score)
        prob = jax.nn.softmax(score, axis=1)
        av = jnp.einsum("ijbn,jbnd->ibnd", prob, v).reshape(qlen, bsz, H * D)
        attn_out = av @ params["wo_t"]
        x = w + attn_out
        mean = jnp.mean(x, axis=-1, keepdims=True)
        var = jnp.mean((x - mean) ** 2, axis=-1, keepdims=True)
        out = (x - mean) / jnp.sqrt(var + LN_EPS) * params["ln_g"] + params["ln_b"]
    return out


# ----------------------------------- main --------------------------------------
if __name__ == "__main__":
    key = jax.random.PRNGKey(0)
    keys = jax.random.split(key, 8)
    H, D = N_HEAD, D_HEAD

    # deterministic parameter init (torch nn.Linear weights are (out, in); we store W.T)
    wqkv = 0.05 * jax.random.normal(keys[0], (3 * H * D, D_MODEL), jnp.float32)
    wr = 0.05 * jax.random.normal(keys[1], (H * D, D_MODEL), jnp.float32)
    wo = 0.05 * jax.random.normal(keys[2], (D_MODEL, H * D), jnp.float32)
    params = {
        "wqkv_t": wqkv.T,
        "wr_t": wr.T,
        "wo_t": wo.T,
        "r_w_bias": 0.05 * jax.random.normal(keys[3], (H, D), jnp.float32),
        "r_r_bias": 0.05 * jax.random.normal(keys[4], (H, D), jnp.float32),
        "ln_g": jnp.ones((D_MODEL,), jnp.float32),
        "ln_b": jnp.zeros((D_MODEL,), jnp.float32),
    }

    w = jax.random.normal(keys[5], (QLEN, BSZ, D_MODEL), jnp.float32)
    r = jax.random.normal(keys[6], (RLEN, D_MODEL), jnp.float32)

    # causal attention mask (True above the diagonal == masked), i.e. dec_attn_mask with
    # mem_len = 0 -- the fused kernel generates the same mask in-kernel via iota.
    attn_mask2d = (jnp.arange(KLEN)[None, :] > jnp.arange(QLEN)[:, None]).astype(jnp.float32)

    out = jax.block_until_ready(rel_partial_attn_forward(w, r, params))
    ref = jax.block_until_ready(reference_forward(w, r, params, attn_mask2d))

    # Tolerance covers bf16 MXU operands + approximate softmax reciprocal vs. the f32
    # "highest precision" reference.
    np.testing.assert_allclose(np.asarray(out), np.asarray(ref), rtol=2e-2, atol=2e-2)
    print("KERNEL_OK")
</pallas_src>

<mosaic_0001>
module attributes {stable_mosaic.version = 11 : i64} {
  func.func @_fused_attn_kernel(%arg0: i32, %arg1: memref<1x8x128xf32, #tpu.memory_space<vmem>>, %arg2: memref<128x128xbf16, #tpu.memory_space<vmem>>, %arg3: memref<128x384xbf16, #tpu.memory_space<vmem>>, %arg4: memref<128x128xbf16, #tpu.memory_space<vmem>>, %arg5: memref<128x128xbf16, #tpu.memory_space<vmem>>, %arg6: memref<4x1x32xf32, #tpu.memory_space<vmem>>, %arg7: memref<4x1x32xf32, #tpu.memory_space<vmem>>, %arg8: memref<1x128xf32, #tpu.memory_space<vmem>>, %arg9: memref<1x128xf32, #tpu.memory_space<vmem>>, %arg10: memref<1x8x128xf32, #tpu.memory_space<vmem>>) attributes {dimension_semantics = [#tpu.dimension_semantics<parallel>], iteration_bounds = array<i64: 2>, scalar_prefetch = 0 : i64, scratch_operands = 0 : i64, tpu.core_type = #tpu.core_type<tc>, window_params = [{transform_indices = @transform_0, window_bounds = array<i64: 1, 8, 128>}, {pipeline_mode = #tpu.pipeline_mode<synchronous>, transform_indices = @transform_1, window_bounds = array<i64: 128, 128>}, {pipeline_mode = #tpu.pipeline_mode<synchronous>, transform_indices = @transform_2, window_bounds = array<i64: 128, 384>}, {pipeline_mode = #tpu.pipeline_mode<synchronous>, transform_indices = @transform_3, window_bounds = array<i64: 128, 128>}, {pipeline_mode = #tpu.pipeline_mode<synchronous>, transform_indices = @transform_4, window_bounds = array<i64: 128, 128>}, {pipeline_mode = #tpu.pipeline_mode<synchronous>, transform_indices = @transform_5, window_bounds = array<i64: 4, 1, 32>}, {pipeline_mode = #tpu.pipeline_mode<synchronous>, transform_indices = @transform_6, window_bounds = array<i64: 4, 1, 32>}, {pipeline_mode = #tpu.pipeline_mode<synchronous>, transform_indices = @transform_7, window_bounds = array<i64: 1, 128>}, {pipeline_mode = #tpu.pipeline_mode<synchronous>, transform_indices = @transform_8, window_bounds = array<i64: 1, 128>}, {transform_indices = @transform_9, window_bounds = array<i64: 1, 8, 128>}]} {
    %c0 = arith.constant 0 : index
    %c0_0 = arith.constant 0 : index
    %c0_1 = arith.constant 0 : index
    %0 = vector.load %arg1[%c0, %c0_0, %c0_1] : memref<1x8x128xf32, #tpu.memory_space<vmem>>, vector<1x8x128xf32>
    %1 = vector.shape_cast %0 : vector<1x8x128xf32> to vector<8x128xf32>
    %2 = arith.truncf %1 : vector<8x128xf32> to vector<8x128xbf16>
    %c0_2 = arith.constant 0 : index
    %c0_3 = arith.constant 0 : index
    %3 = vector.load %arg3[%c0_2, %c0_3] : memref<128x384xbf16, #tpu.memory_space<vmem>>, vector<128x384xbf16>
    %cst = arith.constant dense<0.000000e+00> : vector<8x384xf32>
    %4 = tpu.matmul %2, %3, %cst {dimension_numbers = #tpu.dot_dimension_numbers<[1], [0], [0], [1], [0, 0, 1, 1], [], []>} : vector<8x128xbf16>, vector<128x384xbf16>, vector<8x384xf32> -> vector<8x384xf32>
    %c0_4 = arith.constant 0 : index
    %c0_5 = arith.constant 0 : index
    %5 = vector.load %arg2[%c0_4, %c0_5] : memref<128x128xbf16, #tpu.memory_space<vmem>>, vector<128x128xbf16>
    %c0_6 = arith.constant 0 : index
    %c0_7 = arith.constant 0 : index
    %6 = vector.load %arg4[%c0_6, %c0_7] : memref<128x128xbf16, #tpu.memory_space<vmem>>, vector<128x128xbf16>
    %cst_8 = arith.constant dense<0.000000e+00> : vector<128x128xf32>
    %7 = tpu.matmul %5, %6, %cst_8 {dimension_numbers = #tpu.dot_dimension_numbers<[1], [0], [0], [1], [0, 0, 1, 1], [], []>} : vector<128x128xbf16>, vector<128x128xbf16>, vector<128x128xf32> -> vector<128x128xf32>
    %8 = tpu.iota {dimensions = array<i32: 0>} : vector<8x8xi32>
    %9 = tpu.iota {dimensions = array<i32: 1>} : vector<8x8xi32>
    %10 = arith.cmpi sgt, %9, %8 : vector<8x8xi32>
    %11 = vector.extract_strided_slice %4 {offsets = [0, 0], sizes = [8, 32], strides = [1, 1]} : vector<8x384xf32> to vector<8x32xf32>
    %12 = vector.extract_strided_slice %4 {offsets = [0, 128], sizes = [8, 32], strides = [1, 1]} : vector<8x384xf32> to vector<8x32xf32>
    %13 = arith.truncf %12 : vector<8x32xf32> to vector<8x32xbf16>
    %14 = vector.extract_strided_slice %4 {offsets = [0, 256], sizes = [8, 32], strides = [1, 1]} : vector<8x384xf32> to vector<8x32xf32>
    %15 = arith.truncf %14 : vector<8x32xf32> to vector<8x32xbf16>
    %16 = vector.extract_strided_slice %7 {offsets = [0, 0], sizes = [128, 32], strides = [1, 1]} : vector<128x128xf32> to vector<128x32xf32>
    %17 = arith.truncf %16 : vector<128x32xf32> to vector<128x32xbf16>
    %c0_9 = arith.constant 0 : index
    %c0_10 = arith.constant 0 : index
    %c0_11 = arith.constant 0 : index
    %18 = vector.load %arg6[%c0_9, %c0_10, %c0_11] : memref<4x1x32xf32, #tpu.memory_space<vmem>>, vector<1x1x32xf32>
    %19 = vector.shape_cast %18 : vector<1x1x32xf32> to vector<1x32xf32>
    %20 = vector.broadcast %19 : vector<1x32xf32> to vector<8x32xf32>
    %21 = arith.addf %11, %20 : vector<8x32xf32>
    %22 = arith.truncf %21 : vector<8x32xf32> to vector<8x32xbf16>
    %c0_12 = arith.constant 0 : index
    %c0_13 = arith.constant 0 : index
    %c0_14 = arith.constant 0 : index
    %23 = vector.load %arg7[%c0_12, %c0_13, %c0_14] : memref<4x1x32xf32, #tpu.memory_space<vmem>>, vector<1x1x32xf32>
    %24 = vector.shape_cast %23 : vector<1x1x32xf32> to vector<1x32xf32>
    %25 = vector.broadcast %24 : vector<1x32xf32> to vector<8x32xf32>
    %26 = arith.addf %11, %25 : vector<8x32xf32>
    %27 = arith.truncf %26 : vector<8x32xf32> to vector<8x32xbf16>
    %cst_15 = arith.constant dense<0.000000e+00> : vector<8x8xf32>
    %28 = tpu.matmul %22, %13, %cst_15 {dimension_numbers = #tpu.dot_dimension_numbers<[1], [1], [0], [0], [0, 0, 1, 0], [], []>} : vector<8x32xbf16>, vector<8x32xbf16>, vector<8x8xf32> -> vector<8x8xf32>
    %cst_16 = arith.constant dense<0.000000e+00> : vector<8x128xf32>
    %29 = tpu.matmul %27, %17, %cst_16 {dimension_numbers = #tpu.dot_dimension_numbers<[1], [1], [0], [0], [0, 0, 1, 0], [], []>} : vector<8x32xbf16>, vector<128x32xbf16>, vector<8x128xf32> -> vector<8x128xf32>
    %c121_i32 = arith.constant 121 : i32
    %30 = tpu.dynamic_rotate %29 by %c121_i32 dim 1 {stride = 1 : si32, stride_dimension = 0 : si32} : vector<8x128xf32>, i32 -> vector<8x128xf32>
    %31 = vector.extract_strided_slice %30 {offsets = [0, 0], sizes = [8, 8], strides = [1, 1]} : vector<8x128xf32> to vector<8x8xf32>
    %32 = arith.addf %28, %31 : vector<8x8xf32>
    %cst_17 = arith.constant 0.176776692 : f32
    %33 = vector.broadcast %cst_17 : f32 to vector<8x8xf32>
    %34 = arith.mulf %32, %33 : vector<8x8xf32>
    %cst_18 = arith.constant -1.000000e+30 : f32
    %35 = vector.broadcast %cst_18 : f32 to vector<8x8xf32>
    %36 = arith.select %10, %35, %34 : vector<8x8xi1>, vector<8x8xf32>
    %cst_19 = arith.constant dense<0xFF800000> : vector<8xf32>
    %37 = vector.multi_reduction <maximumf>, %36, %cst_19 [1] : vector<8x8xf32> to vector<8xf32>
    %38 = vector.shape_cast %37 : vector<8xf32> to vector<8x1xf32>
    %39 = vector.broadcast %38 : vector<8x1xf32> to vector<8x8xf32>
    %40 = arith.subf %36, %39 : vector<8x8xf32>
    %41 = math.exp %40 : vector<8x8xf32>
    %cst_20 = arith.constant dense<0.000000e+00> : vector<8xf32>
    %42 = vector.multi_reduction <add>, %41, %cst_20 [1] : vector<8x8xf32> to vector<8xf32>
    %43 = vector.shape_cast %42 : vector<8xf32> to vector<8x1xf32>
    %44 = tpu.reciprocal %43 {approx = true} : vector<8x1xf32> -> vector<8x1xf32>
    %45 = vector.broadcast %44 : vector<8x1xf32> to vector<8x8xf32>
    %46 = arith.mulf %41, %45 : vector<8x8xf32>
    %47 = arith.truncf %46 : vector<8x8xf32> to vector<8x8xbf16>
    %cst_21 = arith.constant dense<0.000000e+00> : vector<8x32xf32>
    %48 = tpu.matmul %47, %15, %cst_21 {dimension_numbers = #tpu.dot_dimension_numbers<[1], [0], [0], [1], [0, 0, 1, 1], [], []>} : vector<8x8xbf16>, vector<8x32xbf16>, vector<8x32xf32> -> vector<8x32xf32>
    %49 = vector.extract_strided_slice %4 {offsets = [0, 32], sizes = [8, 32], strides = [1, 1]} : vector<8x384xf32> to vector<8x32xf32>
    %50 = vector.extract_strided_slice %4 {offsets = [0, 160], sizes = [8, 32], strides = [1, 1]} : vector<8x384xf32> to vector<8x32xf32>
    %51 = arith.truncf %50 : vector<8x32xf32> to vector<8x32xbf16>
    %52 = vector.extract_strided_slice %4 {offsets = [0, 288], sizes = [8, 32], strides = [1, 1]} : vector<8x384xf32> to vector<8x32xf32>
    %53 = arith.truncf %52 : vector<8x32xf32> to vector<8x32xbf16>
    %54 = vector.extract_strided_slice %7 {offsets = [0, 32], sizes = [128, 32], strides = [1, 1]} : vector<128x128xf32> to vector<128x32xf32>
    %55 = arith.truncf %54 : vector<128x32xf32> to vector<128x32xbf16>
    %c1 = arith.constant 1 : index
    %c0_22 = arith.constant 0 : index
    %c0_23 = arith.constant 0 : index
    %56 = vector.load %arg6[%c1, %c0_22, %c0_23] : memref<4x1x32xf32, #tpu.memory_space<vmem>>, vector<1x1x32xf32>
    %57 = vector.shape_cast %56 : vector<1x1x32xf32> to vector<1x32xf32>
    %58 = vector.broadcast %57 : vector<1x32xf32> to vector<8x32xf32>
    %59 = arith.addf %49, %58 : vector<8x32xf32>
    %60 = arith.truncf %59 : vector<8x32xf32> to vector<8x32xbf16>
    %c1_24 = arith.constant 1 : index
    %c0_25 = arith.constant 0 : index
    %c0_26 = arith.constant 0 : index
    %61 = vector.load %arg7[%c1_24, %c0_25, %c0_26] : memref<4x1x32xf32, #tpu.memory_space<vmem>>, vector<1x1x32xf32>
    %62 = vector.shape_cast %61 : vector<1x1x32xf32> to vector<1x32xf32>
    %63 = vector.broadcast %62 : vector<1x32xf32> to vector<8x32xf32>
    %64 = arith.addf %49, %63 : vector<8x32xf32>
    %65 = arith.truncf %64 : vector<8x32xf32> to vector<8x32xbf16>
    %cst_27 = arith.constant dense<0.000000e+00> : vector<8x8xf32>
    %66 = tpu.matmul %60, %51, %cst_27 {dimension_numbers = #tpu.dot_dimension_numbers<[1], [1], [0], [0], [0, 0, 1, 0], [], []>} : vector<8x32xbf16>, vector<8x32xbf16>, vector<8x8xf32> -> vector<8x8xf32>
    %cst_28 = arith.constant dense<0.000000e+00> : vector<8x128xf32>
    %67 = tpu.matmul %65, %55, %cst_28 {dimension_numbers = #tpu.dot_dimension_numbers<[1], [1], [0], [0], [0, 0, 1, 0], [], []>} : vector<8x32xbf16>, vector<128x32xbf16>, vector<8x128xf32> -> vector<8x128xf32>
    %c121_i32_29 = arith.constant 121 : i32
    %68 = tpu.dynamic_rotate %67 by %c121_i32_29 dim 1 {stride = 1 : si32, stride_dimension = 0 : si32} : vector<8x128xf32>, i32 -> vector<8x128xf32>
    %69 = vector.extract_strided_slice %68 {offsets = [0, 0], sizes = [8, 8], strides = [1, 1]} : vector<8x128xf32> to vector<8x8xf32>
    %70 = arith.addf %66, %69 : vector<8x8xf32>
    %cst_30 = arith.constant 0.176776692 : f32
    %71 = vector.broadcast %cst_30 : f32 to vector<8x8xf32>
    %72 = arith.mulf %70, %71 : vector<8x8xf32>
    %cst_31 = arith.constant -1.000000e+30 : f32
    %73 = vector.broadcast %cst_31 : f32 to vector<8x8xf32>
    %74 = arith.select %10, %73, %72 : vector<8x8xi1>, vector<8x8xf32>
    %cst_32 = arith.constant dense<0xFF800000> : vector<8xf32>
    %75 = vector.multi_reduction <maximumf>, %74, %cst_32 [1] : vector<8x8xf32> to vector<8xf32>
    %76 = vector.shape_cast %75 : vector<8xf32> to vector<8x1xf32>
    %77 = vector.broadcast %76 : vector<8x1xf32> to vector<8x8xf32>
    %78 = arith.subf %74, %77 : vector<8x8xf32>
    %79 = math.exp %78 : vector<8x8xf32>
    %cst_33 = arith.constant dense<0.000000e+00> : vector<8xf32>
    %80 = vector.multi_reduction <add>, %79, %cst_33 [1] : vector<8x8xf32> to vector<8xf32>
    %81 = vector.shape_cast %80 : vector<8xf32> to vector<8x1xf32>
    %82 = tpu.reciprocal %81 {approx = true} : vector<8x1xf32> -> vector<8x1xf32>
    %83 = vector.broadcast %82 : vector<8x1xf32> to vector<8x8xf32>
    %84 = arith.mulf %79, %83 : vector<8x8xf32>
    %85 = arith.truncf %84 : vector<8x8xf32> to vector<8x8xbf16>
    %cst_34 = arith.constant dense<0.000000e+00> : vector<8x32xf32>
    %86 = tpu.matmul %85, %53, %cst_34 {dimension_numbers = #tpu.dot_dimension_numbers<[1], [0], [0], [1], [0, 0, 1, 1], [], []>} : vector<8x8xbf16>, vector<8x32xbf16>, vector<8x32xf32> -> vector<8x32xf32>
    %87 = vector.extract_strided_slice %4 {offsets = [0, 64], sizes = [8, 32], strides = [1, 1]} : vector<8x384xf32> to vector<8x32xf32>
    %88 = vector.extract_strided_slice %4 {offsets = [0, 192], sizes = [8, 32], strides = [1, 1]} : vector<8x384xf32> to vector<8x32xf32>
    %89 = arith.truncf %88 : vector<8x32xf32> to vector<8x32xbf16>
    %90 = vector.extract_strided_slice %4 {offsets = [0, 320], sizes = [8, 32], strides = [1, 1]} : vector<8x384xf32> to vector<8x32xf32>
    %91 = arith.truncf %90 : vector<8x32xf32> to vector<8x32xbf16>
    %92 = vector.extract_strided_slice %7 {offsets = [0, 64], sizes = [128, 32], strides = [1, 1]} : vector<128x128xf32> to vector<128x32xf32>
    %93 = arith.truncf %92 : vector<128x32xf32> to vector<128x32xbf16>
    %c2 = arith.constant 2 : index
    %c0_35 = arith.constant 0 : index
    %c0_36 = arith.constant 0 : index
    %94 = vector.load %arg6[%c2, %c0_35, %c0_36] : memref<4x1x32xf32, #tpu.memory_space<vmem>>, vector<1x1x32xf32>
    %95 = vector.shape_cast %94 : vector<1x1x32xf32> to vector<1x32xf32>
    %96 = vector.broadcast %95 : vector<1x32xf32> to vector<8x32xf32>
    %97 = arith.addf %87, %96 : vector<8x32xf32>
    %98 = arith.truncf %97 : vector<8x32xf32> to vector<8x32xbf16>
    %c2_37 = arith.constant 2 : index
    %c0_38 = arith.constant 0 : index
    %c0_39 = arith.constant 0 : index
    %99 = vector.load %arg7[%c2_37, %c0_38, %c0_39] : memref<4x1x32xf32, #tpu.memory_space<vmem>>, vector<1x1x32xf32>
    %100 = vector.shape_cast %99 : vector<1x1x32xf32> to vector<1x32xf32>
    %101 = vector.broadcast %100 : vector<1x32xf32> to vector<8x32xf32>
    %102 = arith.addf %87, %101 : vector<8x32xf32>
    %103 = arith.truncf %102 : vector<8x32xf32> to vector<8x32xbf16>
    %cst_40 = arith.constant dense<0.000000e+00> : vector<8x8xf32>
    %104 = tpu.matmul %98, %89, %cst_40 {dimension_numbers = #tpu.dot_dimension_numbers<[1], [1], [0], [0], [0, 0, 1, 0], [], []>} : vector<8x32xbf16>, vector<8x32xbf16>, vector<8x8xf32> -> vector<8x8xf32>
    %cst_41 = arith.constant dense<0.000000e+00> : vector<8x128xf32>
    %105 = tpu.matmul %103, %93, %cst_41 {dimension_numbers = #tpu.dot_dimension_numbers<[1], [1], [0], [0], [0, 0, 1, 0], [], []>} : vector<8x32xbf16>, vector<128x32xbf16>, vector<8x128xf32> -> vector<8x128xf32>
    %c121_i32_42 = arith.constant 121 : i32
    %106 = tpu.dynamic_rotate %105 by %c121_i32_42 dim 1 {stride = 1 : si32, stride_dimension = 0 : si32} : vector<8x128xf32>, i32 -> vector<8x128xf32>
    %107 = vector.extract_strided_slice %106 {offsets = [0, 0], sizes = [8, 8], strides = [1, 1]} : vector<8x128xf32> to vector<8x8xf32>
    %108 = arith.addf %104, %107 : vector<8x8xf32>
    %cst_43 = arith.constant 0.176776692 : f32
    %109 = vector.broadcast %cst_43 : f32 to vector<8x8xf32>
    %110 = arith.mulf %108, %109 : vector<8x8xf32>
    %cst_44 = arith.constant -1.000000e+30 : f32
    %111 = vector.broadcast %cst_44 : f32 to vector<8x8xf32>
    %112 = arith.select %10, %111, %110 : vector<8x8xi1>, vector<8x8xf32>
    %cst_45 = arith.constant dense<0xFF800000> : vector<8xf32>
    %113 = vector.multi_reduction <maximumf>, %112, %cst_45 [1] : vector<8x8xf32> to vector<8xf32>
    %114 = vector.shape_cast %113 : vector<8xf32> to vector<8x1xf32>
    %115 = vector.broadcast %114 : vector<8x1xf32> to vector<8x8xf32>
    %116 = arith.subf %112, %115 : vector<8x8xf32>
    %117 = math.exp %116 : vector<8x8xf32>
    %cst_46 = arith.constant dense<0.000000e+00> : vector<8xf32>
    %118 = vector.multi_reduction <add>, %117, %cst_46 [1] : vector<8x8xf32> to vector<8xf32>
    %119 = vector.shape_cast %118 : vector<8xf32> to vector<8x1xf32>
    %120 = tpu.reciprocal %119 {approx = true} : vector<8x1xf32> -> vector<8x1xf32>
    %121 = vector.broadcast %120 : vector<8x1xf32> to vector<8x8xf32>
    %122 = arith.mulf %117, %121 : vector<8x8xf32>
    %123 = arith.truncf %122 : vector<8x8xf32> to vector<8x8xbf16>
    %cst_47 = arith.constant dense<0.000000e+00> : vector<8x32xf32>
    %124 = tpu.matmul %123, %91, %cst_47 {dimension_numbers = #tpu.dot_dimension_numbers<[1], [0], [0], [1], [0, 0, 1, 1], [], []>} : vector<8x8xbf16>, vector<8x32xbf16>, vector<8x32xf32> -> vector<8x32xf32>
    %125 = vector.extract_strided_slice %4 {offsets = [0, 96], sizes = [8, 32], strides = [1, 1]} : vector<8x384xf32> to vector<8x32xf32>
    %126 = vector.extract_strided_slice %4 {offsets = [0, 224], sizes = [8, 32], strides = [1, 1]} : vector<8x384xf32> to vector<8x32xf32>
    %127 = arith.truncf %126 : vector<8x32xf32> to vector<8x32xbf16>
    %128 = vector.extract_strided_slice %4 {offsets = [0, 352], sizes = [8, 32], strides = [1, 1]} : vector<8x384xf32> to vector<8x32xf32>
    %129 = arith.truncf %128 : vector<8x32xf32> to vector<8x32xbf16>
    %130 = vector.extract_strided_slice %7 {offsets = [0, 96], sizes = [128, 32], strides = [1, 1]} : vector<128x128xf32> to vector<128x32xf32>
    %131 = arith.truncf %130 : vector<128x32xf32> to vector<128x32xbf16>
    %c3 = arith.constant 3 : index
    %c0_48 = arith.constant 0 : index
    %c0_49 = arith.constant 0 : index
    %132 = vector.load %arg6[%c3, %c0_48, %c0_49] : memref<4x1x32xf32, #tpu.memory_space<vmem>>, vector<1x1x32xf32>
    %133 = vector.shape_cast %132 : vector<1x1x32xf32> to vector<1x32xf32>
    %134 = vector.broadcast %133 : vector<1x32xf32> to vector<8x32xf32>
    %135 = arith.addf %125, %134 : vector<8x32xf32>
    %136 = arith.truncf %135 : vector<8x32xf32> to vector<8x32xbf16>
    %c3_50 = arith.constant 3 : index
    %c0_51 = arith.constant 0 : index
    %c0_52 = arith.constant 0 : index
    %137 = vector.load %arg7[%c3_50, %c0_51, %c0_52] : memref<4x1x32xf32, #tpu.memory_space<vmem>>, vector<1x1x32xf32>
    %138 = vector.shape_cast %137 : vector<1x1x32xf32> to vector<1x32xf32>
    %139 = vector.broadcast %138 : vector<1x32xf32> to vector<8x32xf32>
    %140 = arith.addf %125, %139 : vector<8x32xf32>
    %141 = arith.truncf %140 : vector<8x32xf32> to vector<8x32xbf16>
    %cst_53 = arith.constant dense<0.000000e+00> : vector<8x8xf32>
    %142 = tpu.matmul %136, %127, %cst_53 {dimension_numbers = #tpu.dot_dimension_numbers<[1], [1], [0], [0], [0, 0, 1, 0], [], []>} : vector<8x32xbf16>, vector<8x32xbf16>, vector<8x8xf32> -> vector<8x8xf32>
    %cst_54 = arith.constant dense<0.000000e+00> : vector<8x128xf32>
    %143 = tpu.matmul %141, %131, %cst_54 {dimension_numbers = #tpu.dot_dimension_numbers<[1], [1], [0], [0], [0, 0, 1, 0], [], []>} : vector<8x32xbf16>, vector<128x32xbf16>, vector<8x128xf32> -> vector<8x128xf32>
    %c121_i32_55 = arith.constant 121 : i32
    %144 = tpu.dynamic_rotate %143 by %c121_i32_55 dim 1 {stride = 1 : si32, stride_dimension = 0 : si32} : vector<8x128xf32>, i32 -> vector<8x128xf32>
    %145 = vector.extract_strided_slice %144 {offsets = [0, 0], sizes = [8, 8], strides = [1, 1]} : vector<8x128xf32> to vector<8x8xf32>
    %146 = arith.addf %142, %145 : vector<8x8xf32>
    %cst_56 = arith.constant 0.176776692 : f32
    %147 = vector.broadcast %cst_56 : f32 to vector<8x8xf32>
    %148 = arith.mulf %146, %147 : vector<8x8xf32>
    %cst_57 = arith.constant -1.000000e+30 : f32
    %149 = vector.broadcast %cst_57 : f32 to vector<8x8xf32>
    %150 = arith.select %10, %149, %148 : vector<8x8xi1>, vector<8x8xf32>
    %cst_58 = arith.constant dense<0xFF800000> : vector<8xf32>
    %151 = vector.multi_reduction <maximumf>, %150, %cst_58 [1] : vector<8x8xf32> to vector<8xf32>
    %152 = vector.shape_cast %151 : vector<8xf32> to vector<8x1xf32>
    %153 = vector.broadcast %152 : vector<8x1xf32> to vector<8x8xf32>
    %154 = arith.subf %150, %153 : vector<8x8xf32>
    %155 = math.exp %154 : vector<8x8xf32>
    %cst_59 = arith.constant dense<0.000000e+00> : vector<8xf32>
    %156 = vector.multi_reduction <add>, %155, %cst_59 [1] : vector<8x8xf32> to vector<8xf32>
    %157 = vector.shape_cast %156 : vector<8xf32> to vector<8x1xf32>
    %158 = tpu.reciprocal %157 {approx = true} : vector<8x1xf32> -> vector<8x1xf32>
    %159 = vector.broadcast %158 : vector<8x1xf32> to vector<8x8xf32>
    %160 = arith.mulf %155, %159 : vector<8x8xf32>
    %161 = arith.truncf %160 : vector<8x8xf32> to vector<8x8xbf16>
    %cst_60 = arith.constant dense<0.000000e+00> : vector<8x32xf32>
    %162 = tpu.matmul %161, %129, %cst_60 {dimension_numbers = #tpu.dot_dimension_numbers<[1], [0], [0], [1], [0, 0, 1, 1], [], []>} : vector<8x8xbf16>, vector<8x32xbf16>, vector<8x32xf32> -> vector<8x32xf32>
    %163 = tpu.concatenate %48, %86, %124, %162 in 1 : vector<8x32xf32>, vector<8x32xf32>, vector<8x32xf32>, vector<8x32xf32> -> vector<8x128xf32>
    %164 = arith.truncf %163 : vector<8x128xf32> to vector<8x128xbf16>
    %c0_61 = arith.constant 0 : index
    %c0_62 = arith.constant 0 : index
    %165 = vector.load %arg5[%c0_61, %c0_62] : memref<128x128xbf16, #tpu.memory_space<vmem>>, vector<128x128xbf16>
    %cst_63 = arith.constant dense<0.000000e+00> : vector<8x128xf32>
    %166 = tpu.matmul %164, %165, %cst_63 {dimension_numbers = #tpu.dot_dimension_numbers<[1], [0], [0], [1], [0, 0, 1, 1], [], []>} : vector<8x128xbf16>, vector<128x128xbf16>, vector<8x128xf32> -> vector<8x128xf32>
    %167 = arith.addf %1, %166 : vector<8x128xf32>
    %cst_64 = arith.constant dense<0.000000e+00> : vector<8xf32>
    %168 = vector.multi_reduction <add>, %167, %cst_64 [1] : vector<8x128xf32> to vector<8xf32>
    %169 = vector.shape_cast %168 : vector<8xf32> to vector<8x1xf32>
    %cst_65 = arith.constant 1.280000e+02 : f32
    %170 = vector.broadcast %cst_65 : f32 to vector<8x1xf32>
    %171 = arith.divf %169, %170 : vector<8x1xf32>
    %172 = vector.broadcast %171 : vector<8x1xf32> to vector<8x128xf32>
    %173 = arith.subf %167, %172 : vector<8x128xf32>
    %174 = arith.mulf %173, %173 : vector<8x128xf32>
    %cst_66 = arith.constant dense<0.000000e+00> : vector<8xf32>
    %175 = vector.multi_reduction <add>, %174, %cst_66 [1] : vector<8x128xf32> to vector<8xf32>
    %176 = vector.shape_cast %175 : vector<8xf32> to vector<8x1xf32>
    %cst_67 = arith.constant 1.280000e+02 : f32
    %177 = vector.broadcast %cst_67 : f32 to vector<8x1xf32>
    %178 = arith.divf %176, %177 : vector<8x1xf32>
    %cst_68 = arith.constant 9.99999974E-6 : f32
    %179 = vector.broadcast %cst_68 : f32 to vector<8x1xf32>
    %180 = arith.addf %178, %179 : vector<8x1xf32>
    %181 = math.rsqrt %180 : vector<8x1xf32>
    %182 = vector.broadcast %181 : vector<8x1xf32> to vector<8x128xf32>
    %183 = arith.mulf %173, %182 : vector<8x128xf32>
    %c0_69 = arith.constant 0 : index
    %c0_70 = arith.constant 0 : index
    %184 = vector.load %arg8[%c0_69, %c0_70] : memref<1x128xf32, #tpu.memory_space<vmem>>, vector<1x128xf32>
    %185 = vector.broadcast %184 : vector<1x128xf32> to vector<8x128xf32>
    %186 = arith.mulf %183, %185 : vector<8x128xf32>
    %c0_71 = arith.constant 0 : index
    %c0_72 = arith.constant 0 : index
    %187 = vector.load %arg9[%c0_71, %c0_72] : memref<1x128xf32, #tpu.memory_space<vmem>>, vector<1x128xf32>
    %188 = vector.broadcast %187 : vector<1x128xf32> to vector<8x128xf32>
    %189 = arith.addf %186, %188 : vector<8x128xf32>
    %c0_73 = arith.constant 0 : index
    %c0_74 = arith.constant 0 : index
    %c0_75 = arith.constant 0 : index
    %190 = vector.load %arg10[%c0_73, %c0_74, %c0_75] : memref<1x8x128xf32, #tpu.memory_space<vmem>>, vector<1x8x128xf32>
    %191 = vector.shape_cast %190 : vector<1x8x128xf32> to vector<8x128xf32>
    %192 = vector.shape_cast %189 : vector<8x128xf32> to vector<1x8x128xf32>
    tpu.vector_store %arg10[%c0_73, %c0_74, %c0_75], %192 {strides = array<i32>} : memref<1x8x128xf32, #tpu.memory_space<vmem>>, vector<1x8x128xf32>,
    return
  }
  func.func @transform_0(%arg0: i32) -> (i32, i32, i32) {
    %c0_i32 = arith.constant 0 : i32
    %c0_i32_0 = arith.constant 0 : i32
    %c0_i32_1 = arith.constant 0 : i32
    return %arg0, %c0_i32, %c0_i32_0 : i32, i32, i32
  }
  func.func @transform_1(%arg0: i32) -> (i32, i32) {
    %c0_i32 = arith.constant 0 : i32
    %c0_i32_0 = arith.constant 0 : i32
    %c0_i32_1 = arith.constant 0 : i32
    return %c0_i32, %c0_i32_0 : i32, i32
  }
  func.func @transform_2(%arg0: i32) -> (i32, i32) {
    %c0_i32 = arith.constant 0 : i32
    %c0_i32_0 = arith.constant 0 : i32
    %c0_i32_1 = arith.constant 0 : i32
    return %c0_i32, %c0_i32_0 : i32, i32
  }
  func.func @transform_3(%arg0: i32) -> (i32, i32) {
    %c0_i32 = arith.constant 0 : i32
    %c0_i32_0 = arith.constant 0 : i32
    %c0_i32_1 = arith.constant 0 : i32
    return %c0_i32, %c0_i32_0 : i32, i32
  }
  func.func @transform_4(%arg0: i32) -> (i32, i32) {
    %c0_i32 = arith.constant 0 : i32
    %c0_i32_0 = arith.constant 0 : i32
    %c0_i32_1 = arith.constant 0 : i32
    return %c0_i32, %c0_i32_0 : i32, i32
  }
  func.func @transform_5(%arg0: i32) -> (i32, i32, i32) {
    %c0_i32 = arith.constant 0 : i32
    %c0_i32_0 = arith.constant 0 : i32
    %c0_i32_1 = arith.constant 0 : i32
    %c0_i32_2 = arith.constant 0 : i32
    return %c0_i32, %c0_i32_0, %c0_i32_1 : i32, i32, i32
  }
  func.func @transform_6(%arg0: i32) -> (i32, i32, i32) {
    %c0_i32 = arith.constant 0 : i32
    %c0_i32_0 = arith.constant 0 : i32
    %c0_i32_1 = arith.constant 0 : i32
    %c0_i32_2 = arith.constant 0 : i32
    return %c0_i32, %c0_i32_0, %c0_i32_1 : i32, i32, i32
  }
  func.func @transform_7(%arg0: i32) -> (i32, i32) {
    %c0_i32 = arith.constant 0 : i32
    %c0_i32_0 = arith.constant 0 : i32
    %c0_i32_1 = arith.constant 0 : i32
    return %c0_i32, %c0_i32_0 : i32, i32
  }
  func.func @transform_8(%arg0: i32) -> (i32, i32) {
    %c0_i32 = arith.constant 0 : i32
    %c0_i32_0 = arith.constant 0 : i32
    %c0_i32_1 = arith.constant 0 : i32
    return %c0_i32, %c0_i32_0 : i32, i32
  }
  func.func @transform_9(%arg0: i32) -> (i32, i32, i32) {
    %c0_i32 = arith.constant 0 : i32
    %c0_i32_0 = arith.constant 0 : i32
    %c0_i32_1 = arith.constant 0 : i32
    return %arg0, %c0_i32, %c0_i32_0 : i32, i32, i32
  }
}

</mosaic_0001>

<bundles_post_ra>
// kernel: rel_partial_attn_forward.1
= control target key start
LH: loop header
LB: loop body
LE: loop exit
PB: predicated region body
PF: predicated region fallthrough
CT: control target
= control target key end

     0   :  { %s2432_s30 = smov 0   ;;  %s2926_s0 = inlined_call_operand.vmem [shape: f32[2,8,128], index: 0, kind: input, shape index: {}]   ;;  %s2927_s1 = inlined_call_operand.vmem [shape: bf16[128,128], index: 1, kind: input, shape index: {}]   ;;  %s2928_s2 = inlined_call_operand.vmem [shape: bf16[128,384], index: 2, kind: input, shape index: {}]   ;;  %s2929_s3 = inlined_call_operand.vmem [shape: bf16[128,128], index: 3, kind: input, shape index: {}]   ;;  %s2930_s4 = inlined_call_operand.vmem [shape: bf16[128,128], index: 4, kind: input, shape index: {}]   ;;  %s2931_s5 = inlined_call_operand.vmem [shape: f32[4,1,32], index: 5, kind: input, shape index: {}]   ;;  %s2932_s6 = inlined_call_operand.vmem [shape: f32[4,1,32], index: 6, kind: input, shape index: {}]   ;;  %s2933_s7 = inlined_call_operand.vmem [shape: f32[1,128], index: 7, kind: input, shape index: {}]   ;;  %s2934_s8 = inlined_call_operand.vmem [shape: f32[1,128], index: 8, kind: input, shape index: {}]   ;;  %s2935_s9 = inlined_call_operand.vmem [shape: f32[2,8,128], index: 9, kind: output, shape index: {}]  }
   0x1 LB: > { %s1906_s10 = sadd.s32 4294967295, %s2373_s30   ;;  %p1910_p0 = scmp.ge.s32.totalorder %s2373_s30, 1  ;;  %s2373_s30 = sphi %s2432_s30, %s19_s30  }
   0x2   : > { %p286_p1 = scmp.lt.s32.totalorder %s2373_s30, 3 }
   0x4   : > { %p287_p2 = pnand %p1910_p0, %p286_p1 }
   0x5   : > { %v2292_v0 = vld [vmem:[%s2928_s2 + $0x4] ss:$12 sps:$4 sm:$0xff] (!%p287_p2)   ;;  %v2294_v1 = vld [vmem:[%s2928_s2] ss:$12 sps:$4 sm:$0xff] (!%p287_p2)   ;;  %v2375_v2 = vmov (!%p287_p2), 0   ;;  %p320_p3 = scmp.lt.s32.totalorder (!%p287_p2), %s1906_s10, 1 }
   0x6   : > { %290 = sbr.rel (%p287_p2) target bundleno = 3820 (0xeec), region = 56  ;;  %523 = vmatprep.mubr.bf16.mxu0 (!%p287_p2), %v2375_v2  ;;  %491 = vmatprep.subr.bf16.mxu0 (!%p287_p2), %v2292_v0  ;;  %v2295_v3 = vld [vmem:[%s2928_s2 + $0x1c] ss:$12 sps:$4 sm:$0xff] (!%p287_p2)   ;;  %v2297_v4 = vld [vmem:[%s2928_s2 + $0x18] ss:$12 sps:$4 sm:$0xff] (!%p287_p2)   ;;  %v2318_v22 = vld [vmem:[%s2929_s3 + $0x10] sm:$0xff] (!%p287_p2)  }
   0x7   : > { %492 = vmatpush1.bf16.msra.mxu0 (!%p287_p2), %v2294_v1  ;;  %v2298_v5 = vld [vmem:[%s2928_s2 + $0x34] ss:$12 sps:$4 sm:$0xff] (!%p287_p2)   ;;  %v2300_v6 = vld [vmem:[%s2928_s2 + $0x30] ss:$12 sps:$4 sm:$0xff] (!%p287_p2)   ;;  %v2301_v7 = vld [vmem:[%s2928_s2 + $0x4c] ss:$12 sps:$4 sm:$0xff] (!%p287_p2)  }
   0x8   : > { %493 = vmatprep.subr.bf16.mxu0 (!%p287_p2), %v2295_v3  ;;  %v2303_v8 = vld [vmem:[%s2928_s2 + $0x48] ss:$12 sps:$4 sm:$0xff] (!%p287_p2)   ;;  %v2304_v9 = vld [vmem:[%s2928_s2 + $0x64] ss:$12 sps:$4 sm:$0xff] (!%p287_p2)   ;;  %v2306_v10 = vld [vmem:[%s2928_s2 + $0x60] ss:$12 sps:$4 sm:$0xff] (!%p287_p2)  }
   0x9   : > { %v2307_v11 = vld [vmem:[%s2928_s2 + $0x7c] ss:$12 sps:$4 sm:$0xff] (!%p287_p2)   ;;  %v2309_v12 = vld [vmem:[%s2928_s2 + $0x78] ss:$12 sps:$4 sm:$0xff] (!%p287_p2)   ;;  %v2310_v13 = vld [vmem:[%s2928_s2 + $0x94] ss:$12 sps:$4 sm:$0xff] (!%p287_p2)  }
   0xa   : > { %v2312_v14 = vld [vmem:[%s2928_s2 + $0x90] ss:$12 sps:$4 sm:$0xff] (!%p287_p2)   ;;  %v2313_v15 = vld [vmem:[%s2928_s2 + $0xac] ss:$12 sps:$4 sm:$0xff] (!%p287_p2)   ;;  %v2315_v16 = vld [vmem:[%s2928_s2 + $0xa8] ss:$12 sps:$4 sm:$0xff] (!%p287_p2)  }
   0xb   : > { %494 = vmatpush1.bf16.msra.mxu0 (!%p287_p2), %v2297_v4  ;;  %v2316_v18 = vld [vmem:[%s2929_s3] sm:$0xff] (!%p287_p2)   ;;  %v2317_v21 = vld [vmem:[%s2929_s3 + $0x8] sm:$0xff] (!%p287_p2)   ;;  %v2319_v23 = vld [vmem:[%s2929_s3 + $0x18] sm:$0xff] (!%p287_p2)   ;;  %v2376_v36 = vmov (!%p287_p2), 0.0   ;;  %vm2377_vm0 = vmmov (!%p287_p2), 0   ;;  %vm830_vm1 = vcmask (!%p287_p2), 261120  }
   0xc   : > { %495 = vmatprep.subr.bf16.mxu0 (!%p287_p2), %v2298_v5  ;;  %v2324_v19 = vld [vmem:[%s2927_s1] sm:$0xff] (!%p287_p2)   ;;  %v2321_v25 = vld [vmem:[%s2929_s3 + $0x28] sm:$0xff] (!%p287_p2)   ;;  %v2322_v26 = vld [vmem:[%s2929_s3 + $0x30] sm:$0xff] (!%p287_p2)   ;;  %2077 = vmatprep.subr.bf16.mxu1 (!%p287_p2), %v2376_v36  ;;  %s2378_s27 = smov (!%p287_p2), 96   ;;  %s2379_s11 = smov (!%p287_p2), 32   ;;  %vm966_vm2 = vcmask (!%p287_p2), 1043456  }
   0xd   : > { %s2937_s10 = smov (!%p320_p3, %s1906_s10), 1  ;;  %v2320_v24 = vld [vmem:[%s2929_s3 + $0x20] sm:$0xff]   ;;  %v2323_v27 = vld [vmem:[%s2929_s3 + $0x38] sm:$0xff]   ;;  %v2325_v28 = vld [vmem:[%s2927_s1 + $0x8] sm:$0xff]   ;;  %2093 = vmatprep.mubr.msk.bf16.mxu1 %vm2377_vm0, %v2376_v36  ;;  %s2380_s15 = smov 377   ;;  %vm950_vm4 = vcmask 64512  }
   0xe   : > { %s1911_s14 = sshll.u32 %s2937_s10, 3  ;;  %v2326_v29 = vld [vmem:[%s2927_s1 + $0x10] sm:$0xff]   ;;  %v2327_v30 = vld [vmem:[%s2927_s1 + $0x18] sm:$0xff]   ;;  %v2328_v31 = vld [vmem:[%s2927_s1 + $0x20] sm:$0xff]   ;;  %s2381_s18 = smov 64   ;;  %vm1714_vm5 = vcmask 523264  }
   0xf   : > { %496 = vmatpush1.bf16.msra.mxu0 %v2300_v6  ;;  %s2487_s21 = scalar_lea.vmem %s2926_s0, %s1911_s14  ;;  %v2329_v32 = vld [vmem:[%s2927_s1 + $0x28] sm:$0xff]   ;;  %v2330_v33 = vld [vmem:[%s2927_s1 + $0x30] sm:$0xff]   ;;  %v2331_v34 = vld [vmem:[%s2927_s1 + $0x38] sm:$0xff]   ;;  %vm1716_vm6 = vcmask 785408  }
  0x10   : > { %497 = vmatprep.subr.bf16.mxu0 %v2301_v7  ;;  %v329_v17 = vld [vmem:[%s2487_s21] sm:$0xff]  ;;  %v2332_v35 = vld [vmem:[%s2928_s2 + $0x8] ss:$12 sps:$4 sm:$0xff]   ;;  %v2335_v39 = vld [vmem:[%s2928_s2 + $0x50] ss:$12 sps:$4 sm:$0xff]  }
  0x11   : > { %v2505_v20 = vpack.c.bf16 %v329_v17, %v329_v17  ;;  %2078 = vmatpush3.bf16.msra.mxu1 %v2332_v35  ;;  %v2333_v37 = vld [vmem:[%s2928_s2 + $0x20] ss:$12 sps:$4 sm:$0xff]   ;;  %v2334_v38 = vld [vmem:[%s2928_s2 + $0x38] ss:$12 sps:$4 sm:$0xff]   ;;  %v2336_v40 = vld [vmem:[%s2928_s2 + $0x68] ss:$12 sps:$4 sm:$0xff]  }
  0x12   : > { %2079 = vmatprep.subr.bf16.mxu1 %v2376_v36  ;;  %v2337_v41 = vld [vmem:[%s2928_s2 + $0x80] ss:$12 sps:$4 sm:$0xff]   ;;  %v2338_v42 = vld [vmem:[%s2928_s2 + $0x98] ss:$12 sps:$4 sm:$0xff]   ;;  %v2339_v43 = vld [vmem:[%s2928_s2 + $0xb0] ss:$12 sps:$4 sm:$0xff]  }
  0x13   : > { %498 = vmatpush1.bf16.msra.mxu0 %v2303_v8  ;;  %v1953_v49 = vld [vmem:[%s2931_s5] ss:$0 sm:$0xff]  ;;  %v1961_v60 = vld [vmem:[%s2932_s6 + $0x1] ss:$0 sm:$0xff] }
  0x14   : > { %499 = vmatprep.subr.bf16.mxu0 %v2304_v9 }
  0x15   : > { %2080 = vmatpush3.bf16.msra.mxu1 %v2333_v37 }
  0x16   : > { %2081 = vmatprep.subr.bf16.mxu1 %v2376_v36 }
  0x17   : > { %500 = vmatpush1.bf16.msra.mxu0 %v2306_v10 }
  0x18   : > { %501 = vmatprep.subr.bf16.mxu0 %v2307_v11 }
  0x19   : > { %2082 = vmatpush3.bf16.msra.mxu1 %v2334_v38 }
  0x1a   : > { %2083 = vmatprep.subr.bf16.mxu1 %v2376_v36 }
  0x1b   : > { %502 = vmatpush1.bf16.msra.mxu0 %v2309_v12 }
  0x1c   : > { %503 = vmatprep.subr.bf16.mxu0 %v2310_v13 }
  0x1d   : > { %2084 = vmatpush3.bf16.msra.mxu1 %v2335_v39 }
  0x1e   : > { %2085 = vmatprep.subr.bf16.mxu1 %v2376_v36 }
  0x1f   : > { %504 = vmatpush1.bf16.msra.mxu0 %v2312_v14 }
  0x20   : > { %505 = vmatprep.subr.bf16.mxu0 %v2313_v15 }
  0x21   : > { %2086 = vmatpush3.bf16.msra.mxu1 %v2336_v40 }
  0x22   : > { %2087 = vmatprep.subr.bf16.mxu1 %v2376_v36 }
  0x23   : > { %506 = vmatpush1.bf16.msra.mxu0 %v2315_v16 }
  0x24   : > { %2097 = vmatprep.subr.bf16.mxu0 %v2316_v18 }
  0x25   : > { %2088 = vmatpush3.bf16.msra.mxu1 %v2337_v41 }
  0x26   : > { %524 = vmatmul.mubr.bf16.vlgmr.msra.gmra.mrb[0].mxu0 %v2505_v20  ;;  %2089 = vmatprep.subr.bf16.mxu1 %v2376_v36 }
  0x27   : > { %2098 = vmatpush3.bf16.msra.mxu0 %v2316_v18  ;;  %2113 = vmatprep.mubr.bf16.mxu0 %v2324_v19 }
  0x28   : > { %2099 = vmatprep.subr.bf16.mxu0 %v2317_v21 }
  0x29   : > { %2090 = vmatpush3.bf16.msra.mxu1 %v2338_v42 }
  0x2a   : > { %2091 = vmatprep.subr.bf16.mxu1 %v2376_v36 }
  0x2b   : > { %2100 = vmatpush3.bf16.msra.mxu0 %v2317_v21  ;;  %v1954_v21 = vld [vmem:[%s2932_s6] ss:$0 sm:$0xff] }
  0x2c   : > { %2101 = vmatprep.subr.bf16.mxu0 %v2318_v22 }
  0x2d   : > { %2092 = vmatpush3.bf16.msra.mxu1 %v2339_v43 }
  0x2e   : > { %2129 = vmatprep.subr.bf16.mxu1 %v2376_v36 }
  0x2f   : > { %2102 = vmatpush3.bf16.msra.mxu0 %v2318_v22 }
  0x30   : > { %2103 = vmatprep.subr.bf16.mxu0 %v2319_v23  ;;  %2094 = vmatmul.mubr.bf16.vlgmr.msra.gmra.mrb[0].mxu1 %v2505_v20 }
  0x31   : > { %2145 = vmatprep.mubr.msk.bf16.mxu1 %vm2377_vm0, %v2376_v36 }
  0x33   : > { %2104 = vmatpush3.bf16.msra.mxu0 %v2319_v23 }
  0x34   : > { %2105 = vmatprep.subr.bf16.mxu0 %v2320_v24 }
  0x37   : > { %2106 = vmatpush3.bf16.msra.mxu0 %v2320_v24 }
  0x38   : > { %2107 = vmatprep.subr.bf16.mxu0 %v2321_v25 }
  0x3b   : > { %2108 = vmatpush3.bf16.msra.mxu0 %v2321_v25 }
  0x3c   : > { %2109 = vmatprep.subr.bf16.mxu0 %v2322_v26 }
  0x3f   : > { %2110 = vmatpush3.bf16.msra.mxu0 %v2322_v26 }
  0x40   : > { %2111 = vmatprep.subr.bf16.mxu0 %v2323_v27 }
  0x43   : > { %2112 = vmatpush3.bf16.msra.mxu0 %v2323_v27 }
  0x44   : > { %2149 = vmatprep.subr.bf16.mxu0 %v2376_v36 }
  0x46   : > { %2114 = vmatmul.mubr.bf16.vlgmr.msra.gmra.mrb[4].mxu0 %v2325_v28 }
  0x47   : > { %2117 = vmatprep.mubr.bf16.mxu0 %v2326_v29 }
  0x4e   : > { %2118 = vmatmul.mubr.bf16.gmra.mrb[8].mxu0 %v2327_v30 }
  0x4f   : > { %2121 = vmatprep.mubr.bf16.mxu0 %v2328_v31 }
  0x56   : > { %2122 = vmatmul.mubr.bf16.gmra.mrb[12].mxu0 %v2329_v32 }
  0x57   : > { %2125 = vmatprep.mubr.bf16.mxu0 %v2330_v33 }
  0x5e   : > { %2126 = vmatmul.mubr.bf16.gmra.mrb[16].mxu0 %v2331_v34 }
  0x5f   : > { %2151 = vmatprep.mubr.msk.bf16.mxu0 %vm2377_vm0, %v2376_v36 }
  0xf9   : > { %v2591_v44 = vpop.f32.mrb[0].mxu0 }
  0xfa   : > { %v527_v45 = vpop.f32.mrb[1].mxu0  ;;  %v819_v51 = vadd.f32 %v1953_v49, %v2591_v44  ;;  %v828_v23 = vadd.f32 %v1954_v21, %v2591_v44 }
  0xfb   : > { %v2593_v46 = vpack.c.bf16 %v527_v45, %v527_v45  ;;  %v529_v47 = vpop.f32.mrb[2].mxu0 }
  0xfc   : > { %v530_v48 = vpop.f32.mrb[3].mxu0  ;;  %v820_v52 = vpack.c.bf16 %v819_v51, %v819_v51  ;;  %v829_v24 = vpack.c.bf16 %v828_v23, %v828_v23 }
  0xfd   : > { %v906_v50 = vsel %vm830_vm1, %v2593_v46, 0 }
  0xfe   : > { %2150 = vmatpush3.bf16.xpose.msra.mxu0 %v906_v50 }
  0xff   : > { %2155 = vmatprep.subr.bf16.mxu0 %v2376_v36 }
 0x103   : > { %v566_v25 = vpop.f32.mrb[0].mxu1 }
 0x104   : > { %v2672_v26 = vpack.c.bf16 %v566_v25, %v566_v25  ;;  %v2095_v27 = vpop.f32.mrb[1].mxu1 }
 0x105   : > { %2152 = vmatmul.mubr.msk.bf16.vlgmr.msra.gmra.mrb[20].mxu0 %vm830_vm1, %v820_v52  ;;  %v569_v28 = vpop.f32.mrb[2].mxu1 }
 0x106   : > { %2157 = vmatprep.mubr.msk.bf16.mxu0 %vm2377_vm0, %v2376_v36  ;;  %v2096_v29 = vpop.f32.mrb[3].mxu1  ;;  %v968_v30 = vsel %vm966_vm2, %v2672_v26, 0 }
 0x107   : > { %2156 = vmatpush3.bf16.msra.mxu0 %v968_v30 }
 0x108   : > { %2181 = vmatprep.subr.bf16.mxu0 %v2376_v36 }
 0x119   : > { %v2115_v53 = vpop.f32.mrb[4].mxu0 }
 0x11a   : > { %v734_v54 = vpop.f32.mrb[5].mxu0 }
 0x11b   : > { %v2116_v55 = vpop.f32.mrb[6].mxu0 }
 0x11c   : > { %v2605_v56 = vpack.c.bf16 %v2116_v55, %v2115_v53  ;;  %v737_v57 = vpop.f32.mrb[7].mxu0 }
 0x11d   : > { %v2607_v58 = vpack.c.bf16 %v737_v57, %v734_v54 }
 0x11e   : > { %v838_v3 = vsel %vm830_vm1, %v2605_v56, 0 }
 0x11f   : > { %1045 = vrot.lane.b32.xlu1 %v2607_v58, %s2378_s27  ;;  %v835_v59 = vsel %vm830_vm1, %v2607_v58, 0 }
 0x120   : > { %2130 = vmatpush3.bf16.xpose.msra.mxu1 %v835_v59 }
 0x121   : > { %v2119_v61 = vpop.f32.mrb[8].mxu0  ;;  %2131 = vmatprep.subr.bf16.mxu1 %v2376_v36 }
 0x122   : > { %v750_v62 = vpop.f32.mrb[9].mxu0 }
 0x123   : > { %1029 = vrot.lane.b32.xlu1 %v1961_v60, %s2379_s11  ;;  %v2120_v63 = vpop.f32.mrb[10].mxu0 }
 0x124   : > { %v2618_v0 = vpack.c.bf16 %v2120_v63, %v2119_v61  ;;  %v753_v1 = vpop.f32.mrb[11].mxu0 }
 0x125   : > { %v2620_v2 = vpack.c.bf16 %v753_v1, %v750_v62  ;;  %v797_v1 = vlaneseq }
 0x126   : > { %v844_v17 = vsel %vm830_vm1, %v2618_v0, 0 }
 0x127   : > { %1047 = vrot.lane.b32.xlu1 %v2605_v56, %s2378_s27  ;;  %v841_v10 = vsel %vm830_vm1, %v2620_v2, 0 }
 0x128   : > { %2132 = vmatpush3.bf16.xpose.msra.mxu1 %v838_v3  ;;  %v2699_v3 = vshrl.u32 %v797_v1, 7 }
 0x129   : > { %2133 = vmatprep.subr.bf16.mxu1 %v2376_v36  ;;  %v2123_v4 = vpop.f32.mrb[12].mxu0 }
 0x12a   : > { %v766_v5 = vpop.f32.mrb[13].mxu0 }
 0x12b   : > { %1049 = vrot.lane.b32.xlu1 %v2620_v2, %s2378_s27  ;;  %v2124_v6 = vpop.f32.mrb[14].mxu0 }
 0x12c   : > { %v2629_v7 = vpack.c.bf16 %v2124_v6, %v2123_v4  ;;  %v769_v8 = vpop.f32.mrb[15].mxu0  ;;  %v2701_v4 = vand.u32 127, %v797_v1  ;;  %v1966_v1 = vld [vmem:[%s2931_s5 + $0x2] ss:$0 sm:$0xff] }
 0x12d   : > { %v2631_v9 = vpack.c.bf16 %v769_v8, %v766_v5 }
 0x12e   : > { %v850_v19 = vsel %vm830_vm1, %v2629_v7, 0  ;;  %vm801_vm3 = vcmp.gt.s32.totalorder %v2701_v4, %v2699_v3 }
 0x12f   : > { %1051 = vrot.lane.b32.xlu1 %v2618_v0, %s2378_s27  ;;  %v847_v18 = vsel %vm830_vm1, %v2631_v9, 0 }
 0x130   : > { %2134 = vmatpush3.bf16.xpose.msra.mxu1 %v841_v10 }
 0x131   : > { %2135 = vmatprep.subr.bf16.mxu1 %v2376_v36  ;;  %v2127_v11 = vpop.f32.mrb[16].mxu0 }
 0x132   : > { %v782_v12 = vpop.f32.mrb[17].mxu0 }
 0x133   : > { %1053 = vrot.lane.b32.xlu1 %v2631_v9, %s2378_s27  ;;  %v2128_v13 = vpop.f32.mrb[18].mxu0 }
 0x134   : > { %v2640_v14 = vpack.c.bf16 %v2128_v13, %v2127_v11  ;;  %v785_v15 = vpop.f32.mrb[19].mxu0 }
 0x135   : > { %v2642_v16 = vpack.c.bf16 %v785_v15, %v782_v12  ;;  %v1959_v12 = vld [vmem:[%s2931_s5 + $0x1] ss:$0 sm:$0xff] }
 0x136   : > { %v856_v22 = vsel %vm830_vm1, %v2640_v14, 0 }
 0x137   : > { %1055 = vrot.lane.b32.xlu1 %v2629_v7, %s2378_s27  ;;  %v853_v20 = vsel %vm830_vm1, %v2642_v16, 0 }
 0x138   : > { %2136 = vmatpush3.bf16.xpose.msra.mxu1 %v844_v17 }
 0x139   : > { %2137 = vmatprep.subr.bf16.mxu1 %v2376_v36 }
 0x13b   : > { %1057 = vrot.lane.b32.xlu1 %v2642_v16, %s2378_s27 }
 0x13f   : > { %1059 = vrot.lane.b32.xlu1 %v2640_v14, %s2378_s27 }
 0x140   : > { %2138 = vmatpush3.bf16.xpose.msra.mxu1 %v847_v18 }
 0x141   : > { %2139 = vmatprep.subr.bf16.mxu1 %v2376_v36 }
 0x148   : > { %2140 = vmatpush3.bf16.xpose.msra.mxu1 %v850_v19 }
 0x149   : > { %2141 = vmatprep.subr.bf16.mxu1 %v2376_v36 }
 0x150   : > { %2142 = vmatpush3.bf16.xpose.msra.mxu1 %v853_v20 }
 0x151   : > { %2143 = vmatprep.subr.bf16.mxu1 %v2376_v36 }
 0x158   : > { %2144 = vmatpush3.bf16.xpose.msra.mxu1 %v856_v22 }
 0x159   : > { %2161 = vmatprep.subr.bf16.mxu1 %v2376_v36 }
 0x15f   : > { %2146 = vmatmul.mubr.msk.bf16.vlgmr.msra.gmra.mrb[4].mxu1 %vm830_vm1, %v829_v24 }
 0x160   : > { %2177 = vmatprep.mubr.msk.bf16.mxu1 %vm2377_vm0, %v2376_v36 }
 0x191   : > { %v1046_v31 = vpop.permute.xlu1 %1045 }
 0x192   : > { %v1065_v32 = vsel %vm830_vm1, %v1046_v31, 0 }
 0x193   : > { %2162 = vmatpush3.bf16.xpose.msra.mxu1 %v1065_v32 }
 0x194   : > { %2163 = vmatprep.subr.bf16.mxu1 %v2376_v36 }
 0x195   : > { %v1030_v33 = vpop.permute.xlu1 %1029 }
 0x196   : > { %v1032_v34 = vadd.f32 %v1030_v33, %v2591_v44 }
 0x198   : > { %v1033_v35 = vpack.c.bf16 %v1032_v34, %v1032_v34 }
 0x199   : > { %v1048_v37 = vpop.permute.xlu1 %1047 }
 0x19a   : > { %v1068_v38 = vsel %vm830_vm1, %v1048_v37, 0  ;;  %1035 = vrot.lane.b32.xlu1 %v1033_v35, %s2378_s27 }
 0x19b   : > { %2164 = vmatpush3.bf16.xpose.msra.mxu1 %v1068_v38 }
 0x19c   : > { %2165 = vmatprep.subr.bf16.mxu1 %v2376_v36 }
 0x19d   : > { %v1050_v39 = vpop.permute.xlu1 %1049 }
 0x19e   : > { %v1071_v40 = vsel %vm830_vm1, %v1050_v39, 0 }
 0x1a1   : > { %v1052_v41 = vpop.permute.xlu1 %1051 }
 0x1a2   : > { %v1074_v42 = vsel %vm830_vm1, %v1052_v41, 0 }
 0x1a3   : > { %2166 = vmatpush3.bf16.xpose.msra.mxu1 %v1071_v40 }
 0x1a4   : > { %2167 = vmatprep.subr.bf16.mxu1 %v2376_v36 }
 0x1a5   : > { %v1054_v43 = vpop.permute.xlu1 %1053 }
 0x1a6   : > { %v1077_v45 = vsel %vm830_vm1, %v1054_v43, 0 }
 0x1a9   : > { %v1056_v47 = vpop.permute.xlu1 %1055 }
 0x1aa   : > { %v1080_v48 = vsel %vm830_vm1, %v1056_v47, 0 }
 0x1ab   : > { %2168 = vmatpush3.bf16.xpose.msra.mxu1 %v1074_v42 }
 0x1ac   : > { %2169 = vmatprep.subr.bf16.mxu1 %v2376_v36 }
 0x1ad   : > { %v1058_v49 = vpop.permute.xlu1 %1057 }
 0x1ae   : > { %v1083_v50 = vsel %vm830_vm1, %v1058_v49, 0 }
 0x1b1   : > { %v1060_v51 = vpop.permute.xlu1 %1059 }
 0x1b2   : > { %v1086_v52 = vsel %vm830_vm1, %v1060_v51, 0 }
 0x1b3   : > { %2170 = vmatpush3.bf16.xpose.msra.mxu1 %v1077_v45 }
 0x1b4   : > { %2171 = vmatprep.subr.bf16.mxu1 %v2376_v36 }
 0x1bb   : > { %2172 = vmatpush3.bf16.xpose.msra.mxu1 %v1080_v48 }
 0x1bc   : > { %2173 = vmatprep.subr.bf16.mxu1 %v2376_v36 }
 0x1c3   : > { %2174 = vmatpush3.bf16.xpose.msra.mxu1 %v1083_v50 }
 0x1c4   : > { %2175 = vmatprep.subr.bf16.mxu1 %v2376_v36 }
 0x1cb   : > { %2176 = vmatpush3.bf16.xpose.msra.mxu1 %v1086_v52 }
 0x1cc   : > { %2213 = vmatprep.subr.bf16.mxu1 %v2376_v36 }
 0x1d8   : > { %v942_v53 = vpop.f32.mrb[20].mxu0 }
 0x1d9   : > { %v2153_v54 = vpop.f32.mrb[21].mxu0 }
 0x1da   : > { %v945_v55 = vpop.f32.mrb[22].mxu0 }
 0x1db   : > { %v2154_v57 = vpop.f32.mrb[23].mxu0 }
 0x20c   : > { %v1036_v59 = vpop.permute.xlu1 %1035 }
 0x20d   : > { %2178 = vmatmul.mubr.msk.bf16.vlgmr.msra.gmra.mrb[8].mxu1 %vm830_vm1, %v1036_v59 }
 0x20e   : > { %2215 = vmatprep.mubr.msk.bf16.mxu1 %vm2377_vm0, %v2376_v36 }
 0x232   : > { %v892_v60 = vpop.f32.mrb[4].mxu1 }
 0x233   : > { %900 = vrot.lane.b32.xlu0 %v892_v60, %s2380_s15  ;;  %v2147_v61 = vpop.f32.mrb[5].mxu1 }
 0x234   : > { %v895_v62 = vpop.f32.mrb[6].mxu1 }
 0x235   : > { %v2148_v63 = vpop.f32.mrb[7].mxu1 }
 0x2a5   : > { %v901_v5 = vpop.permute.xlu0 %900 }
 0x2a6   : > { %v943_v6 = vadd.f32 %v942_v53, %v901_v5  ;;  %v1968_v53 = vld [vmem:[%s2932_s6 + $0x2] ss:$0 sm:$0xff] }
 0x2a8   : > { %v948_v8 = vmul.f32 0.17677669, %v943_v6 }
 0x2aa   : > { %v949_v10 = vsel %vm801_vm3, -1e+30, %v948_v8 }
 0x2ab   : > { %v951_v11 = vsel %vm950_vm4, %v949_v10, -inf }
 0x2ac   : > { %952 = vmax.xlane.f32.xlu0 %v951_v11 }
 0x2c2   : > { %1017 = vrot.lane.b32.xlu0 %v1959_v12, %s2379_s11 }
 0x2c6   : > { %1136 = vrot.lane.b32.xlu0 %v2593_v46, %s2378_s27 }
 0x2e0   : > { %v1122_v13 = vpop.f32.mrb[8].mxu1 }
 0x2e1   : > { %v2179_v15 = vpop.f32.mrb[9].mxu1 }
 0x2e2   : > { %v1125_v17 = vpop.f32.mrb[10].mxu1 }
 0x2e3   : > { %v2180_v18 = vpop.f32.mrb[11].mxu1 }
 0x339   : > { %v953_v19 = vpop.xlane.xlu0 %952 }
 0x33a   : > { %v954_v20 = vsub.f32 %v949_v10, %v953_v19 }
 0x33c   : > { %v955_v21 = vmul.f32 1.442695, %v954_v20 }
 0x33d   : > { %v1018_v22 = vpop.permute.xlu0 %1017 }
 0x33e   : > { %2348 = vpow2.f32 %v955_v21  ;;  %v1020_v23 = vadd.f32 %v1018_v22, %v2591_v44 }
 0x340   : > { %v1021_v24 = vpack.c.bf16 %v1020_v23, %v1020_v23 }
 0x341   : > { %v1137_v31 = vpop.permute.xlu0 %1136 }
 0x342   : > { %1133 = vrot.lane.b32.xlu0 %v1021_v24, %s2378_s27  ;;  %v1142_v33 = vsel %vm830_vm1, %v1137_v31, 0 }
 0x346   : > { %1130 = vrot.lane.b32.xlu0 %v1122_v13, %s2380_s15 }
 0x348   : > { %v2349_v25 = vpop.eup %2348 }
 0x349   : > { %v957_v27 = vsel %vm950_vm4, %v2349_v25, 0.0 }
 0x34a   : > { %958 = vadd.xlane.f32.xlu1 %v957_v27 }
 0x35b   : > { %1199 = vrot.lane.b32.xlu1 %v2672_v26, %s2378_s27 }
 0x35f   : > { %1274 = vrot.lane.b32.xlu1 %v2607_v58, %s2381_s18 }
 0x3b4   : > { %v1134_v35 = vpop.permute.xlu0 %1133 }
 0x3b8   : > { %v1131_v42 = vpop.permute.xlu0 %1130 }
 0x3d7   : > { %v959_v28 = vpop.xlane.xlu1 %958 }
 0x3d8   : > { %2350 = vrcp.f32 %v959_v28 }
 0x3db   : > { %v1200_v34 = vpop.permute.xlu1 %1199 }
 0x3dc   : > { %v1205_v37 = vsel %vm966_vm2, %v1200_v34, 0 }
 0x3df   : > { %v1275_v5 = vpop.permute.xlu1 %1274 }
 0x3e0   : > { %v1294_v17 = vsel %vm830_vm1, %v1275_v5, 0 }
 0x3e2   : > { %v2351_v29 = vpop.eup %2350 }
 0x3e3   : > { %v961_v30 = vmul.f32 %v2351_v29, %v2349_v25 }
 0x3e5   : > { %v962_v32 = vpack.c.bf16 %v961_v30, %v961_v30 }
 0x3e7   : > { %2158 = vmatmul.mubr.msk.bf16.vlgmr.msra.gmra.mrb[24].mxu0 %vm950_vm4, %v962_v32 }
 0x3e8   : > { %2182 = vmatpush3.bf16.xpose.msra.mxu0 %v1142_v33  ;;  %2183 = vmatprep.mubr.msk.bf16.mxu0 %vm2377_vm0, %v2376_v36 }
 0x3e9   : > { %2187 = vmatprep.subr.bf16.mxu0 %v2376_v36 }
 0x3ef   : > { %2184 = vmatmul.mubr.msk.bf16.vlgmr.msra.gmra.mrb[28].mxu0 %vm830_vm1, %v1134_v35 }
 0x3f0   : > { %2188 = vmatpush3.bf16.msra.mxu0 %v1205_v37  ;;  %2189 = vmatprep.mubr.msk.bf16.mxu0 %vm2377_vm0, %v2376_v36 }
 0x3f1   : > { %2193 = vmatprep.subr.bf16.mxu0 %v2376_v36 }
 0x4ba   : > { %v2733_v38 = vpop.f32.mrb[24].mxu0 }
 0x4bb   : > { %v2159_v39 = vpop.f32.mrb[25].mxu0 }
 0x4bc   : > { %v1007_v40 = vpop.f32.mrb[26].mxu0 }
 0x4bd   : > { %v2160_v41 = vpop.f32.mrb[27].mxu0 }
 0x4c2   : > { %v1178_v43 = vpop.f32.mrb[28].mxu0 }
 0x4c3   : > { %v1179_v45 = vadd.f32 %v1178_v43, %v1131_v42  ;;  %v2185_v47 = vpop.f32.mrb[29].mxu0 }
 0x4c4   : > { %v1181_v48 = vpop.f32.mrb[30].mxu0 }
 0x4c5   : > { %v1184_v49 = vmul.f32 0.17677669, %v1179_v45  ;;  %v2186_v50 = vpop.f32.mrb[31].mxu0 }
 0x4c7   : > { %v1185_v51 = vsel %vm801_vm3, -1e+30, %v1184_v49 }
 0x4c8   : > { %v1186_v52 = vsel %vm950_vm4, %v1185_v51, -inf }
 0x4c9   : > { %1187 = vmax.xlane.f32.xlu0 %v1186_v52 }
 0x4df   : > { %1266 = vrot.lane.b32.xlu0 %v1968_v53, %s2381_s18 }
 0x4e3   : > { %1288 = vrot.lane.b32.xlu0 %v2640_v14, %s2381_s18 }
 0x556   : > { %v1188_v54 = vpop.xlane.xlu0 %1187 }
 0x557   : > { %v1189_v55 = vsub.f32 %v1185_v51, %v1188_v54 }
 0x559   : > { %v1190_v57 = vmul.f32 1.442695, %v1189_v55 }
 0x55a   : > { %v1267_v59 = vpop.permute.xlu0 %1266 }
 0x55b   : > { %2352 = vpow2.f32 %v1190_v57  ;;  %v1269_v60 = vadd.f32 %v1267_v59, %v2591_v44 }
 0x55d   : > { %v1270_v61 = vpack.c.bf16 %v1269_v60, %v1269_v60  ;;  %v1973_v60 = vld [vmem:[%s2931_s5 + $0x3] ss:$0 sm:$0xff] }
 0x55e   : > { %v1289_v33 = vpop.permute.xlu0 %1288 }
 0x55f   : > { %1272 = vrot.lane.b32.xlu0 %v1270_v61, %s2381_s18  ;;  %v1315_v34 = vsel %vm830_vm1, %v1289_v33, 0 }
 0x565   : > { %v2353_v62 = vpop.eup %2352 }
 0x566   : > { %v1192_v63 = vsel %vm950_vm4, %v2353_v62, 0.0 }
 0x567   : > { %1193 = vadd.xlane.f32.xlu1 %v1192_v63 }
 0x578   : > { %1276 = vrot.lane.b32.xlu1 %v2605_v56, %s2381_s18 }
 0x57c   : > { %1278 = vrot.lane.b32.xlu1 %v2620_v2, %s2381_s18 }
 0x580   : > { %1280 = vrot.lane.b32.xlu1 %v2618_v0, %s2381_s18 }
 0x584   : > { %1282 = vrot.lane.b32.xlu1 %v2631_v9, %s2381_s18 }
 0x588   : > { %1284 = vrot.lane.b32.xlu1 %v2629_v7, %s2381_s18 }
 0x58c   : > { %1286 = vrot.lane.b32.xlu1 %v2642_v16, %s2381_s18 }
 0x590   : > { %1254 = vrot.lane.b32.xlu1 %v1966_v1, %s2381_s18 }
 0x594   : > { %1364 = vrot.lane.b32.xlu1 %v2593_v46, %s2381_s18 }
 0x5d1   : > { %v1273_v35 = vpop.permute.xlu0 %1272 }
 0x5f4   : > { %v1194_v6 = vpop.xlane.xlu1 %1193 }
 0x5f5   : > { %2354 = vrcp.f32 %v1194_v6 }
 0x5f8   : > { %v1277_v8 = vpop.permute.xlu1 %1276 }
 0x5f9   : > { %v1297_v20 = vsel %vm830_vm1, %v1277_v8, 0 }
 0x5fc   : > { %v1279_v10 = vpop.permute.xlu1 %1278 }
 0x5fd   : > { %v1300_v25 = vsel %vm830_vm1, %v1279_v10, 0 }
 0x5ff   : > { %v2355_v11 = vpop.eup %2354 }
 0x600   : > { %v1196_v12 = vmul.f32 %v2355_v11, %v2353_v62  ;;  %v1281_v13 = vpop.permute.xlu1 %1280 }
 0x601   : > { %v1303_v29 = vsel %vm830_vm1, %v1281_v13, 0 }
 0x602   : > { %v1197_v15 = vpack.c.bf16 %v1196_v12, %v1196_v12 }
 0x604   : > { %2190 = vmatmul.mubr.msk.bf16.vlgmr.msra.gmra.mrb[32].mxu0 %vm950_vm4, %v1197_v15  ;;  %v1283_v18 = vpop.permute.xlu1 %1282 }
 0x605   : > { %2194 = vmatpush3.bf16.xpose.msra.mxu0 %v1294_v17  ;;  %2209 = vmatprep.mubr.msk.bf16.mxu0 %vm2377_vm0, %v2376_v36  ;;  %v1306_v30 = vsel %vm830_vm1, %v1283_v18, 0 }
 0x606   : > { %2195 = vmatprep.subr.bf16.mxu0 %v2376_v36 }
 0x608   : > { %v1285_v19 = vpop.permute.xlu1 %1284 }
 0x609   : > { %v1309_v31 = vsel %vm830_vm1, %v1285_v19, 0 }
 0x60c   : > { %v1287_v21 = vpop.permute.xlu1 %1286 }
 0x60d   : > { %2196 = vmatpush3.bf16.xpose.msra.mxu0 %v1297_v20  ;;  %v1312_v32 = vsel %vm830_vm1, %v1287_v21, 0 }
 0x60e   : > { %2197 = vmatprep.subr.bf16.mxu0 %v2376_v36 }
 0x610   : > { %v1255_v22 = vpop.permute.xlu1 %1254 }
 0x611   : > { %v1257_v23 = vadd.f32 %v1255_v22, %v2591_v44 }
 0x613   : > { %v1258_v24 = vpack.c.bf16 %v1257_v23, %v1257_v23 }
 0x614   : > { %v1365_v27 = vpop.permute.xlu1 %1364 }
 0x615   : > { %2198 = vmatpush3.bf16.xpose.msra.mxu0 %v1300_v25  ;;  %v1370_v28 = vsel %vm830_vm1, %v1365_v27, 0  ;;  %1362 = vrot.lane.b32.xlu0 %v1258_v24, %s2381_s18 }
 0x616   : > { %2214 = vmatpush3.bf16.xpose.msra.mxu1 %v1370_v28  ;;  %2199 = vmatprep.subr.bf16.mxu0 %v2376_v36 }
 0x617   : > { %2219 = vmatprep.subr.bf16.mxu1 %v2376_v36 }
 0x61d   : > { %2200 = vmatpush3.bf16.xpose.msra.mxu0 %v1303_v29 }
 0x61e   : > { %2201 = vmatprep.subr.bf16.mxu0 %v2376_v36 }
 0x625   : > { %2202 = vmatpush3.bf16.xpose.msra.mxu0 %v1306_v30 }
 0x626   : > { %2203 = vmatprep.subr.bf16.mxu0 %v2376_v36 }
 0x62d   : > { %2204 = vmatpush3.bf16.xpose.msra.mxu0 %v1309_v31 }
 0x62e   : > { %2205 = vmatprep.subr.bf16.mxu0 %v2376_v36 }
 0x635   : > { %2206 = vmatpush3.bf16.xpose.msra.mxu0 %v1312_v32 }
 0x636   : > { %2207 = vmatprep.subr.bf16.mxu0 %v2376_v36 }
 0x63d   : > { %2208 = vmatpush3.bf16.xpose.msra.mxu0 %v1315_v34 }
 0x63e   : > { %2245 = vmatprep.subr.bf16.mxu0 %v2376_v36 }
 0x644   : > { %2210 = vmatmul.mubr.msk.bf16.vlgmr.msra.gmra.mrb[36].mxu0 %vm830_vm1, %v1273_v35 }
 0x645   : > { %2247 = vmatprep.mubr.msk.bf16.mxu0 %vm2377_vm0, %v2376_v36 }
 0x687   : > { %v1363_v37 = vpop.permute.xlu0 %1362 }
 0x688   : > { %2216 = vmatmul.mubr.msk.bf16.vlgmr.msra.gmra.mrb[12].mxu1 %vm830_vm1, %v1363_v37 }
 0x689   : > { %2221 = vmatprep.mubr.msk.bf16.mxu1 %vm2377_vm0, %v2376_v36 }
 0x6d7   : > { %v2795_v39 = vpop.f32.mrb[32].mxu0 }
 0x6d8   : > { %v2191_v40 = vpop.f32.mrb[33].mxu0 }
 0x6d9   : > { %v1244_v41 = vpop.f32.mrb[34].mxu0 }
 0x6da   : > { %v2192_v42 = vpop.f32.mrb[35].mxu0 }
 0x717   : > { %v1351_v43 = vpop.f32.mrb[36].mxu0 }
 0x718   : > { %1359 = vrot.lane.b32.xlu1 %v1351_v43, %s2380_s15  ;;  %v2211_v45 = vpop.f32.mrb[37].mxu0 }
 0x719   : > { %v1354_v47 = vpop.f32.mrb[38].mxu0 }
 0x71a   : > { %v2212_v48 = vpop.f32.mrb[39].mxu0 }
 0x71c   : > { %1501 = vrot.lane.b32.xlu1 %v2607_v58, %s2379_s11  ;;  %v1975_v58 = vld [vmem:[%s2932_s6 + $0x3] ss:$0 sm:$0xff] }
 0x75b   : > { %v1406_v49 = vpop.f32.mrb[12].mxu1 }
 0x75c   : > { %v2217_v50 = vpop.f32.mrb[13].mxu1 }
 0x75d   : > { %v1409_v51 = vpop.f32.mrb[14].mxu1 }
 0x75e   : > { %v2218_v52 = vpop.f32.mrb[15].mxu1 }
 0x78a   : > { %v1360_v53 = vpop.permute.xlu1 %1359 }
 0x78b   : > { %v1407_v54 = vadd.f32 %v1406_v49, %v1360_v53 }
 0x78d   : > { %v1412_v55 = vmul.f32 0.17677669, %v1407_v54 }
 0x78f   : > { %v1413_v57 = vsel %vm801_vm3, -1e+30, %v1412_v55 }
 0x790   : > { %v1414_v59 = vsel %vm950_vm4, %v1413_v57, -inf }
 0x791   : > { %1415 = vmax.xlane.f32.xlu0 %v1414_v59 }
 0x7a7   : > { %1426 = vrot.lane.b32.xlu0 %v2672_v26, %s2381_s18 }
 0x7ab   : > { %1493 = vrot.lane.b32.xlu0 %v1975_v58, %s2378_s27 }
 0x7af   : > { %1505 = vrot.lane.b32.xlu0 %v2620_v2, %s2379_s11 }
 0x7b3   : > { %1509 = vrot.lane.b32.xlu0 %v2631_v9, %s2379_s11 }
 0x7b7   : > { %1513 = vrot.lane.b32.xlu0 %v2642_v16, %s2379_s11 }
 0x7bb   : > { %1481 = vrot.lane.b32.xlu0 %v1973_v60, %s2378_s27 }
 0x7bf   : > { %1591 = vrot.lane.b32.xlu0 %v2593_v46, %s2379_s11 }
 0x81e   : > { %v1416_v61 = vpop.xlane.xlu0 %1415 }
 0x81f   : > { %v1417_v62 = vsub.f32 %v1413_v57, %v1416_v61 }
 0x821   : > { %v1418_v63 = vmul.f32 1.442695, %v1417_v62 }
 0x822   : > { %v1427_v1 = vpop.permute.xlu0 %1426 }
 0x823   : > { %2356 = vpow2.f32 %v1418_v63  ;;  %v1432_v2 = vsel %vm966_vm2, %v1427_v1, 0 }
 0x824   : > { %2220 = vmatpush3.bf16.msra.mxu1 %v1432_v2  ;;  %v2341_v2 = vld [vmem:[%s2930_s4 + $0x8] sm:$0xff]  }
 0x825   : > { %2225 = vmatprep.subr.bf16.mxu1 %v2376_v36 }
 0x826   : > { %v1494_v9 = vpop.permute.xlu0 %1493 }
 0x827   : > { %v1496_v13 = vadd.f32 %v1494_v9, %v2591_v44  ;;  %v2342_v9 = vld [vmem:[%s2930_s4 + $0x10] sm:$0xff]  }
 0x829   : > { %v1497_v15 = vpack.c.bf16 %v1496_v13, %v1496_v13 }
 0x82a   : > { %v1506_v16 = vpop.permute.xlu0 %1505 }
 0x82b   : > { %v1527_v28 = vsel %vm830_vm1, %v1506_v16, 0  ;;  %v2343_v16 = vld [vmem:[%s2930_s4 + $0x18] sm:$0xff]  }
 0x82d   : > { %v2357_v5 = vpop.eup %2356 }
 0x82e   : > { %v1510_v6 = vpop.permute.xlu0 %1509  ;;  %v1420_v8 = vsel %vm950_vm4, %v2357_v5, 0.0 }
 0x82f   : > { %1421 = vadd.xlane.f32.xlu1 %v1420_v8  ;;  %v1533_v30 = vsel %vm830_vm1, %v1510_v6, 0  ;;  %v2345_v6 = vld [vmem:[%s2930_s4 + $0x28] sm:$0xff]   ;;  %v2346_v8 = vld [vmem:[%s2930_s4 + $0x30] sm:$0xff]  }
 0x832   : > { %v1514_v10 = vpop.permute.xlu0 %1513 }
 0x833   : > { %v1539_v32 = vsel %vm830_vm1, %v1514_v10, 0  ;;  %v2347_v10 = vld [vmem:[%s2930_s4 + $0x38] sm:$0xff]  }
 0x836   : > { %v1482_v11 = vpop.permute.xlu0 %1481 }
 0x837   : > { %v1484_v17 = vadd.f32 %v1482_v11, %v2591_v44 }
 0x839   : > { %v1485_v18 = vpack.c.bf16 %v1484_v17, %v1484_v17 }
 0x83a   : > { %v1592_v46 = vpop.permute.xlu0 %1591 }
 0x83b   : > { %v1597_v12 = vsel %vm830_vm1, %v1592_v46, 0 }
 0x83c   : > { %2246 = vmatpush3.bf16.xpose.msra.mxu0 %v1597_v12 }
 0x83d   : > { %2251 = vmatprep.subr.bf16.mxu0 %v2376_v36 }
 0x840   : > { %1503 = vrot.lane.b32.xlu1 %v2605_v56, %s2379_s11  ;;  %v1502_v56 = vpop.permute.xlu1 %1501 }
 0x841   : > { %v1521_v24 = vsel %vm830_vm1, %v1502_v56, 0 }
 0x844   : > { %1507 = vrot.lane.b32.xlu1 %v2618_v0, %s2379_s11 }
 0x848   : > { %1511 = vrot.lane.b32.xlu1 %v2629_v7, %s2379_s11 }
 0x84c   : > { %1515 = vrot.lane.b32.xlu1 %v2640_v14, %s2379_s11 }
 0x850   : > { %1499 = vrot.lane.b32.xlu1 %v1497_v15, %s2379_s11 }
 0x854   : > { %1589 = vrot.lane.b32.xlu1 %v1485_v18, %s2379_s11 }
 0x8bc   : > { %v1422_v19 = vpop.xlane.xlu1 %1421 }
 0x8bd   : > { %2358 = vrcp.f32 %v1422_v19 }
 0x8c0   : > { %v1504_v0 = vpop.permute.xlu1 %1503 }
 0x8c1   : > { %v1524_v25 = vsel %vm830_vm1, %v1504_v0, 0 }
 0x8c4   : > { %v1508_v20 = vpop.permute.xlu1 %1507 }
 0x8c5   : > { %v1530_v29 = vsel %vm830_vm1, %v1508_v20, 0 }
 0x8c7   : > { %v2359_v21 = vpop.eup %2358 }
 0x8c8   : > { %v1424_v7 = vmul.f32 %v2359_v21, %v2357_v5  ;;  %v1512_v22 = vpop.permute.xlu1 %1511  ;;  %v2344_v5 = vld [vmem:[%s2930_s4 + $0x20] sm:$0xff]  }
 0x8c9   : > { %v1536_v31 = vsel %vm830_vm1, %v1512_v22, 0  ;;  %v2366_v21 = vld [vmem:[%s2487_s21] sm:$0xff] }
 0x8ca   : > { %v1425_v23 = vpack.c.bf16 %v1424_v7, %v1424_v7 }
 0x8cc   : > { %v1516_v14 = vpop.permute.xlu1 %1515  ;;  %2222 = vmatmul.mubr.msk.bf16.vlgmr.msra.gmra.mrb[16].mxu1 %vm950_vm4, %v1425_v23 }
 0x8cd   : > { %2226 = vmatpush3.bf16.xpose.msra.mxu1 %v1521_v24  ;;  %2241 = vmatprep.mubr.msk.bf16.mxu1 %vm2377_vm0, %v2376_v36  ;;  %v1542_v33 = vsel %vm830_vm1, %v1516_v14, 0 }
 0x8ce   : > { %2227 = vmatprep.subr.bf16.mxu1 %v2376_v36 }
 0x8d0   : > { %v1500_v44 = vpop.permute.xlu1 %1499 }
 0x8d4   : > { %v1590_v27 = vpop.permute.xlu1 %1589 }
 0x8d5   : > { %2228 = vmatpush3.bf16.xpose.msra.mxu1 %v1524_v25  ;;  %2248 = vmatmul.mubr.msk.bf16.vlgmr.msra.gmra.mrb[40].mxu0 %vm830_vm1, %v1590_v27 }
 0x8d6   : > { %2229 = vmatprep.subr.bf16.mxu1 %v2376_v36  ;;  %2253 = vmatprep.mubr.msk.bf16.mxu0 %vm2377_vm0, %v2376_v36 }
 0x8dd   : > { %2230 = vmatpush3.bf16.xpose.msra.mxu1 %v1527_v28 }
 0x8de   : > { %2231 = vmatprep.subr.bf16.mxu1 %v2376_v36 }
 0x8e5   : > { %2232 = vmatpush3.bf16.xpose.msra.mxu1 %v1530_v29 }
 0x8e6   : > { %2233 = vmatprep.subr.bf16.mxu1 %v2376_v36 }
 0x8ed   : > { %2234 = vmatpush3.bf16.xpose.msra.mxu1 %v1533_v30 }
 0x8ee   : > { %2235 = vmatprep.subr.bf16.mxu1 %v2376_v36 }
 0x8f5   : > { %2236 = vmatpush3.bf16.xpose.msra.mxu1 %v1536_v31  ;;  %v1987_v31 = vld [vmem:[%s2933_s7] ss:$0 sm:$0xff] }
 0x8f6   : > { %2237 = vmatprep.subr.bf16.mxu1 %v2376_v36 }
 0x8fd   : > { %2238 = vmatpush3.bf16.xpose.msra.mxu1 %v1539_v32 }
 0x8fe   : > { %2239 = vmatprep.subr.bf16.mxu1 %v2376_v36 }
 0x905   : > { %2240 = vmatpush3.bf16.xpose.msra.mxu1 %v1542_v33  ;;  %v1988_v33 = vld [vmem:[%s2934_s8] ss:$0 sm:$0xff] }
 0x90c   : > { %2242 = vmatmul.mubr.msk.bf16.vlgmr.msra.gmra.mrb[20].mxu1 %vm830_vm1, %v1500_v44 }
 0x99f   : > { %v1468_v34 = vpop.f32.mrb[16].mxu1 }
 0x9a0   : > { %v2223_v35 = vpop.f32.mrb[17].mxu1 }
 0x9a1   : > { %v1471_v37 = vpop.f32.mrb[18].mxu1 }
 0x9a2   : > { %v2224_v40 = vpop.f32.mrb[19].mxu1 }
 0x9a8   : > { %v1633_v41 = vpop.f32.mrb[40].mxu0 }
 0x9a9   : > { %v2249_v42 = vpop.f32.mrb[41].mxu0 }
 0x9aa   : > { %v1636_v43 = vpop.f32.mrb[42].mxu0 }
 0x9ab   : > { %v2250_v45 = vpop.f32.mrb[43].mxu0 }
 0x9df   : > { %v1578_v47 = vpop.f32.mrb[20].mxu1 }
 0x9e0   : > { %1586 = vrot.lane.b32.xlu0 %v1578_v47, %s2380_s15  ;;  %v2243_v48 = vpop.f32.mrb[21].mxu1  ;;  %s327_s15 = scalar_lea.vmem %s2935_s9, %s1911_s14 }
 0x9e1   : > { %v1581_v49 = vpop.f32.mrb[22].mxu1 }
 0x9e2   : > { %v2244_v50 = vpop.f32.mrb[23].mxu1 }
 0xa52   : > { %v1587_v51 = vpop.permute.xlu0 %1586 }
 0xa53   : > { %v1634_v52 = vadd.f32 %v1633_v41, %v1587_v51 }
 0xa55   : > { %v1639_v53 = vmul.f32 0.17677669, %v1634_v52 }
 0xa57   : > { %v1640_v54 = vsel %vm801_vm3, -1e+30, %v1639_v53 }
 0xa58   : > { %v1641_v55 = vsel %vm950_vm4, %v1640_v54, -inf }
 0xa59   : > { %1642 = vmax.xlane.f32.xlu1 %v1641_v55 }
 0xa6a   : > { %1702 = vrot.lane.b32.xlu1 %v2795_v39, %s2379_s11 }
 0xa6e   : > { %1706 = vrot.lane.b32.xlu1 %v1468_v34, %s2381_s18 }
 0xae6   : > { %v1643_v57 = vpop.xlane.xlu1 %1642 }
 0xae7   : > { %v1644_v59 = vsub.f32 %v1640_v54, %v1643_v57 }
 0xae9   : > { %v1645_v58 = vmul.f32 1.442695, %v1644_v59 }
 0xaea   : > { %v1703_v15 = vpop.permute.xlu1 %1702 }
 0xaeb   : > { %2360 = vpow2.f32 %v1645_v58  ;;  %v1713_v18 = vsel %vm830_vm1, %v2733_v38, %v1703_v15 }
 0xaee   : > { %v1707_v17 = vpop.permute.xlu1 %1706 }
 0xaf5   : > { %v2361_v60 = vpop.eup %2360 }
 0xaf6   : > { %v1647_v61 = vsel %vm950_vm4, %v2361_v60, 0.0 }
 0xaf7   : > { %1648 = vadd.xlane.f32.xlu0 %v1647_v61 }
 0xb0d   : > { %1653 = vrot.lane.b32.xlu0 %v2672_v26, %s2379_s11  ;;  %v2340_v26 = vld [vmem:[%s2930_s4] sm:$0xff]  }
 0xb84   : > { %v1649_v3 = vpop.xlane.xlu0 %1648 }
 0xb85   : > { %2362 = vrcp.f32 %v1649_v3 }
 0xb88   : > { %v1654_v4 = vpop.permute.xlu0 %1653 }
 0xb89   : > { %v1659_v62 = vsel %vm966_vm2, %v1654_v4, 0 }
 0xb8a   : > { %2252 = vmatpush3.bf16.msra.mxu0 %v1659_v62 }
 0xb8b   : > { %2257 = vmatprep.subr.bf16.mxu0 %v2376_v36 }
 0xb8f   : > { %v2363_v39 = vpop.eup %2362 }
 0xb90   : > { %v1651_v63 = vmul.f32 %v2363_v39, %v2361_v60 }
 0xb92   : > { %v1652_v1 = vpack.c.bf16 %v1651_v63, %v1651_v63 }
 0xb94   : > { %2254 = vmatmul.mubr.msk.bf16.vlgmr.msra.gmra.mrb[44].mxu0 %vm950_vm4, %v1652_v1 }
 0xb95   : > { %2273 = vmatprep.mubr.msk.bf16.mxu0 %vm2377_vm0, %v2376_v36  ;;  %2258 = vmatpush3.bf16.msra.mxu0 %v2340_v26 }
 0xb96   : > { %2259 = vmatprep.subr.bf16.mxu0 %v2376_v36 }
 0xb99   : > { %2260 = vmatpush3.bf16.msra.mxu0 %v2341_v2 }
 0xb9a   : > { %2261 = vmatprep.subr.bf16.mxu0 %v2376_v36 }
 0xb9d   : > { %2262 = vmatpush3.bf16.msra.mxu0 %v2342_v9 }
 0xb9e   : > { %2263 = vmatprep.subr.bf16.mxu0 %v2376_v36 }
 0xba1   : > { %2264 = vmatpush3.bf16.msra.mxu0 %v2343_v16 }
 0xba2   : > { %2265 = vmatprep.subr.bf16.mxu0 %v2376_v36 }
 0xba5   : > { %2266 = vmatpush3.bf16.msra.mxu0 %v2344_v5 }
 0xba6   : > { %2267 = vmatprep.subr.bf16.mxu0 %v2376_v36 }
 0xba9   : > { %2268 = vmatpush3.bf16.msra.mxu0 %v2345_v6 }
 0xbaa   : > { %2269 = vmatprep.subr.bf16.mxu0 %v2376_v36 }
 0xbad   : > { %2270 = vmatpush3.bf16.msra.mxu0 %v2346_v8 }
 0xbae   : > { %2271 = vmatprep.subr.bf16.mxu0 %v2376_v36  ;;  %v1715_v36 = vsel %vm1714_vm5, %v1713_v18, %v1707_v17 }
 0xbb1   : > { %2272 = vmatpush3.bf16.msra.mxu0 %v2347_v10 }
 0xc67   : > { %v1695_v11 = vpop.f32.mrb[44].mxu0 }
 0xc68   : > { %1710 = vrot.lane.b32.xlu0 %v1695_v11, %s2378_s27  ;;  %v2255_v46 = vpop.f32.mrb[45].mxu0 }
 0xc69   : > { %v1698_v12 = vpop.f32.mrb[46].mxu0 }
 0xc6a   : > { %v2256_v13 = vpop.f32.mrb[47].mxu0 }
 0xcda   : > { %v1711_v56 = vpop.permute.xlu0 %1710 }
 0xcdb   : > { %v1717_v19 = vsel %vm1716_vm6, %v1715_v36, %v1711_v56 }
 0xcdc   : > { %v1718_v0 = vpack.c.bf16 %v1717_v19, %v1717_v19 }
 0xcde   : > { %2274 = vmatmul.mubr.bf16.vlgmr.msra.gmra.mrb[48].mxu0 %v1718_v0 }
 0xdb1   : > { %v1817_v20 = vpop.f32.mrb[48].mxu0 }
 0xdb2   : > { %v1823_v7 = vadd.f32 %v2366_v21, %v1817_v20  ;;  %v2275_v22 = vpop.f32.mrb[49].mxu0 }
 0xdb3   : > { %v1820_v23 = vpop.f32.mrb[50].mxu0 }
 0xdb4   : > { %1824 = vadd.xlane.f32.xlu1 %v1823_v7  ;;  %v2276_v24 = vpop.f32.mrb[51].mxu0 }
 0xe41   : > { %v1825_v14 = vpop.xlane.xlu1 %1824 }
 0xe42   : > { %v1827_v44 = vmul.f32 0.0078125, %v1825_v14 }
 0xe44   : > { %v1828_v25 = vsub.f32 %v1823_v7, %v1827_v44 }
 0xe46   : > { %v1829_v27 = vmul.f32 %v1828_v25, %v1828_v25 }
 0xe48   : > { %1830 = vadd.xlane.f32.xlu0 %v1829_v27 }
 0xed5   : > { %v1831_v28 = vpop.xlane.xlu0 %1830 }
 0xed6   : > { %v1832_v38 = vmul.f32 0.0078125, %v1831_v28 }
 0xed8   : > { %v1833_v29 = vadd.f32 1e-05, %v1832_v38 }
 0xeda   : > { %2364 = vrsqrt.f32 %v1833_v29 }
 0xee4   : > { %v2365_v30 = vpop.eup %2364 }
 0xee5   : > { %v1835_v32 = vmul.f32 %v2365_v30, %v1828_v25 }
 0xee7   : > { %v1843_v34 = vmul.f32 %v1987_v31, %v1835_v32 }
 0xee9   : > { %v1851_v35 = vadd.f32 %v1988_v33, %v1843_v34 }
 0xeeb   : > { %1852 = vst [vmem:[%s327_s15] sm:$0xff] %v1851_v35 }
 0xeec PF: > { %s19_s30 = sadd.s32 1, %s2373_s30  }
 0xeed   : > { %p16_p4 = scmp.ge.s32.totalorder %s19_s30, 4  }
 0xeef   :  { %18 = sbr.rel (!%p16_p4) target bundleno = 1 (0x1), region = 92 }

</bundles_post_ra>
